<compile_context>
chip_gen: v7x
topology: tpu7x:2x2x1
jax: 0.10.0
libtpu: 0.0.40
codegen_flags: <defaults>
</compile_context>

<pallas_src>
import jax
import jax.numpy as jnp
from jax.experimental import pallas as pl
from jax.experimental.pallas import tpu as pltpu

IN_FEATURES = 4032
OUT_FEATURES = 120
OUT_PADDED = 128            # lane-dense output block (multiple of 128)
DROP_P = 0.5
DEFAULT_BLOCK_B = 512       # bf16: ~4.1 MiB x-tile; ~30 MiB peak VMEM -> fits all chips
                            # (v6e can use 1024; raise vmem_limit_bytes accordingly)

# 32-bit odd hash multipliers, written as signed int32 literals.
_HASH_C1 = -1640531527      # 0x9E3779B9
_HASH_C2 = -2048144789      # 0x85EBCA6B
_HASH_C3 = -1028477387      # 0xC2B2AE35
_SEED_C = 179424673         # odd prime, mixes the seed into the row hash


def _round_up(n, m):
    return ((n + m - 1) // m) * m


def _avalanche(v):
    """mul / xor-shift / mul mixer on a small int32 array (cheap: tiny shapes)."""
    v = v * _HASH_C1
    v = v ^ ((v >> 16) & 0xFFFF)     # logical >>16 for int32
    return v * _HASH_C2


def _make_kernel(training):
    def kernel(seed_ref, x_ref, wt_ref, b_ref, o_ref):
        x = x_ref[...]                                   # bf16 (tb, 4032)
        if training:
            tb, k = x_ref.shape
            row_start = pl.program_id(0) * tb            # global row offset per tile
            rows = jax.lax.broadcasted_iota(jnp.int32, (tb, 1), 0) + row_start
            cols = jax.lax.broadcasted_iota(jnp.int32, (1, k), 1)
            rh = _avalanche(rows + seed_ref[0] * _SEED_C)    # (tb, 1)
            ch = _avalanche(cols)                            # (1, k)
            # Per-element work: xor (bcast), mul, cmp, select  (~4 VALU ops/elem).
            keep = ((rh ^ ch) * _HASH_C3) >= 0               # p(keep) ~= 0.5
            # Survivor scale 1/(1-p)=2.0 is folded into wt_ref; just zero dropped.
            x = jnp.where(keep, x, jnp.bfloat16(0.0))
        else:
            # Eval mode: dropout is identity; undo the folded 2.0 scale exactly.
            x = x * jnp.bfloat16(0.5)

        # Linear: (tb, 4032) bf16 @ (4032, 128) bf16 -> f32 on the MXU, + bias.
        o_ref[...] = (
            jnp.dot(x, wt_ref[...], preferred_element_type=jnp.float32)
            + b_ref[...]
        )
    return kernel


def prepare_params(weight, bias):
    """One-time prep: transpose, fold 2.0 dropout scale, pad 120->128, cast bf16."""
    scale = jnp.float32(1.0 / (1.0 - DROP_P))                      # 2.0, exact in bf16
    w_t = jnp.transpose(weight).astype(jnp.float32) * scale        # (4032, 120)
    w_pad = jnp.zeros((IN_FEATURES, OUT_PADDED), jnp.float32)
    w_pad = w_pad.at[:, :OUT_FEATURES].set(w_t)
    b_pad = jnp.zeros((1, OUT_PADDED), jnp.float32)
    b_pad = b_pad.at[0, :OUT_FEATURES].set(bias.astype(jnp.float32))
    return w_pad.astype(jnp.bfloat16), b_pad                       # bias stays f32


def drop_classifier_forward_padded(x, w_prepped, b_prepped, *, seed=0,
                                   training=True, block_b=DEFAULT_BLOCK_B):
    """Hot path. x: (B, 4032); returns padded (B, 128) f32 (cols 120..127 are bias pad)."""
    B = x.shape[0]
    if x.dtype != jnp.bfloat16:
        # Ideally the producer already hands us bf16 so this extra HBM pass vanishes.
        x = x.astype(jnp.bfloat16)

    # Balanced, 16-aligned batch tiles (bf16 sublane minimum is 16).
    tb = _round_up(pl.cdiv(B, pl.cdiv(B, block_b)), 16)
    grid = (pl.cdiv(B, tb),)
    seed_arr = jnp.asarray(seed, dtype=jnp.int32).reshape((1,))

    return pl.pallas_call(
        _make_kernel(training),
        out_shape=jax.ShapeDtypeStruct((B, OUT_PADDED), jnp.float32),
        grid=grid,
        in_specs=[
            pl.BlockSpec(memory_space=pltpu.MemorySpace.SMEM),            # seed scalar
            pl.BlockSpec((tb, IN_FEATURES), lambda i: (i, 0)),            # x tile (streamed bf16)
            pl.BlockSpec((IN_FEATURES, OUT_PADDED), lambda i: (0, 0)),    # W^T bf16 (VMEM-resident)
            pl.BlockSpec((1, OUT_PADDED), lambda i: (0, 0)),              # bias f32 (VMEM-resident)
        ],
        out_specs=pl.BlockSpec((tb, OUT_PADDED), lambda i: (i, 0)),
        compiler_params=pltpu.CompilerParams(
            dimension_semantics=("parallel",),        # megacore: split batch across TCs
            vmem_limit_bytes=48 * 1024 * 1024,        # clears v5e's 16 MiB scoped default
        ),
    )(seed_arr, x, w_prepped, b_prepped)


def drop_classifier_forward(x, w_prepped, b_prepped, **kwargs):
    """API boundary: slice back to the 120 real output features."""
    return drop_classifier_forward_padded(x, w_prepped, b_prepped, **kwargs)[:, :OUT_FEATURES]


if __name__ == "__main__":
    key = jax.random.PRNGKey(0)
    k_x, k_w, k_b = jax.random.split(key, 3)

    B = 8
    seed = 0
    x = jax.random.normal(k_x, (B, IN_FEATURES), dtype=jnp.float32)

    # nn.Linear default init: U(-1/sqrt(in), 1/sqrt(in)).
    bound = 1.0 / (IN_FEATURES ** 0.5)
    weight = jax.random.uniform(k_w, (OUT_FEATURES, IN_FEATURES), dtype=jnp.float32,
                                minval=-bound, maxval=bound)
    bias = jax.random.uniform(k_b, (OUT_FEATURES,), dtype=jnp.float32,
                              minval=-bound, maxval=bound)

    # One-time parameter prep (hoisted out of the per-call path).
    w_prepped, b_prepped = prepare_params(weight, bias)

    # Training-mode forward (dropout active).
    out = drop_classifier_forward(x, w_prepped, b_prepped, seed=seed, training=True)
    out = jax.block_until_ready(out)
    assert out.shape == (B, OUT_FEATURES) and out.dtype == jnp.float32

    # Pure-JAX reference replicating the kernel's separable hash mask exactly.
    x_bf16 = x.astype(jnp.bfloat16)
    rows = jnp.arange(B, dtype=jnp.int32)[:, None]
    cols = jnp.arange(IN_FEATURES, dtype=jnp.int32)[None, :]

    def avalanche_ref(v):
        v = v * _HASH_C1
        v = v ^ ((v >> 16) & 0xFFFF)
        return v * _HASH_C2

    rh = avalanche_ref(rows + jnp.int32(seed) * _SEED_C)
    ch = avalanche_ref(cols)
    keep_ref = ((rh ^ ch) * _HASH_C3) >= 0
    x_drop = jnp.where(keep_ref, x_bf16, jnp.bfloat16(0.0)).astype(jnp.float32)
    y_ref = (x_drop @ w_prepped.astype(jnp.float32) + b_prepped)[:, :OUT_FEATURES]

    assert bool(jnp.all(jnp.isfinite(out)))
    assert jnp.allclose(out, y_ref, rtol=2e-2, atol=2e-2)

    # Eval-mode forward (dropout identity; folded 2.0 scale undone in-kernel).
    out_eval = drop_classifier_forward(x, w_prepped, b_prepped, seed=seed, training=False)
    out_eval = jax.block_until_ready(out_eval)
    y_eval_ref = ((x_bf16.astype(jnp.float32) * 0.5) @ w_prepped.astype(jnp.float32)
                  + b_prepped)[:, :OUT_FEATURES]
    assert jnp.allclose(out_eval, y_eval_ref, rtol=2e-2, atol=2e-2)

    print("KERNEL_OK")
</pallas_src>

<mosaic_0001>
module attributes {stable_mosaic.version = 11 : i64} {
  func.func @kernel(%arg0: i32, %arg1: memref<1xi32, #tpu.memory_space<smem>>, %arg2: memref<16x4032xbf16, #tpu.memory_space<vmem>>, %arg3: memref<4032x128xbf16, #tpu.memory_space<vmem>>, %arg4: memref<1x128xf32, #tpu.memory_space<vmem>>, %arg5: memref<16x128xf32, #tpu.memory_space<vmem>>) attributes {dimension_semantics = [#tpu.dimension_semantics<parallel>], iteration_bounds = array<i64: 1>, scalar_prefetch = 0 : i64, scratch_operands = 0 : i64, tpu.core_type = #tpu.core_type<tc>, window_params = [{transform_indices = @transform_0, window_bounds = array<i64: 1>}, {transform_indices = @transform_1, window_bounds = array<i64: 16, 4032>}, {pipeline_mode = #tpu.pipeline_mode<synchronous>, transform_indices = @transform_2, window_bounds = array<i64: 4032, 128>}, {pipeline_mode = #tpu.pipeline_mode<synchronous>, transform_indices = @transform_3, window_bounds = array<i64: 1, 128>}, {transform_indices = @transform_4, window_bounds = array<i64: 16, 128>}]} {
    %c0 = arith.constant 0 : index
    %c0_0 = arith.constant 0 : index
    %0 = vector.load %arg2[%c0, %c0_0] : memref<16x4032xbf16, #tpu.memory_space<vmem>>, vector<16x4032xbf16>
    %c16_i32 = arith.constant 16 : i32
    %1 = arith.muli %arg0, %c16_i32 : i32
    %2 = tpu.iota {dimensions = array<i32: 0>} : vector<16x1xi32>
    %3 = vector.broadcast %1 : i32 to vector<16x1xi32>
    %4 = arith.addi %2, %3 : vector<16x1xi32>
    %5 = tpu.iota {dimensions = array<i32: 1>} : vector<1x4032xi32>
    %c0_1 = arith.constant 0 : index
    %6 = memref.load %arg1[%c0_1] : memref<1xi32, #tpu.memory_space<smem>>
    %c179424673_i32 = arith.constant 179424673 : i32
    %7 = arith.muli %6, %c179424673_i32 : i32
    %8 = vector.broadcast %7 : i32 to vector<16x1xi32>
    %9 = arith.addi %4, %8 : vector<16x1xi32>
    %c-1640531527_i32 = arith.constant -1640531527 : i32
    %10 = vector.broadcast %c-1640531527_i32 : i32 to vector<16x1xi32>
    %11 = arith.muli %9, %10 : vector<16x1xi32>
    %c16_i32_2 = arith.constant 16 : i32
    %12 = vector.broadcast %c16_i32_2 : i32 to vector<16x1xi32>
    %13 = arith.shrsi %11, %12 : vector<16x1xi32>
    %c65535_i32 = arith.constant 65535 : i32
    %14 = vector.broadcast %c65535_i32 : i32 to vector<16x1xi32>
    %15 = arith.andi %13, %14 : vector<16x1xi32>
    %16 = arith.xori %11, %15 : vector<16x1xi32>
    %c-2048144789_i32 = arith.constant -2048144789 : i32
    %17 = vector.broadcast %c-2048144789_i32 : i32 to vector<16x1xi32>
    %18 = arith.muli %16, %17 : vector<16x1xi32>
    %c-1640531527_i32_3 = arith.constant -1640531527 : i32
    %19 = vector.broadcast %c-1640531527_i32_3 : i32 to vector<1x4032xi32>
    %20 = arith.muli %5, %19 : vector<1x4032xi32>
    %c16_i32_4 = arith.constant 16 : i32
    %21 = vector.broadcast %c16_i32_4 : i32 to vector<1x4032xi32>
    %22 = arith.shrsi %20, %21 : vector<1x4032xi32>
    %c65535_i32_5 = arith.constant 65535 : i32
    %23 = vector.broadcast %c65535_i32_5 : i32 to vector<1x4032xi32>
    %24 = arith.andi %22, %23 : vector<1x4032xi32>
    %25 = arith.xori %20, %24 : vector<1x4032xi32>
    %c-2048144789_i32_6 = arith.constant -2048144789 : i32
    %26 = vector.broadcast %c-2048144789_i32_6 : i32 to vector<1x4032xi32>
    %27 = arith.muli %25, %26 : vector<1x4032xi32>
    %28 = vector.broadcast %18 : vector<16x1xi32> to vector<16x4032xi32>
    %29 = vector.broadcast %27 : vector<1x4032xi32> to vector<16x4032xi32>
    %30 = arith.xori %28, %29 : vector<16x4032xi32>
    %c-1028477387_i32 = arith.constant -1028477387 : i32
    %31 = vector.broadcast %c-1028477387_i32 : i32 to vector<16x4032xi32>
    %32 = arith.muli %30, %31 : vector<16x4032xi32>
    %c0_i32 = arith.constant 0 : i32
    %33 = vector.broadcast %c0_i32 : i32 to vector<16x4032xi32>
    %34 = arith.cmpi sge, %32, %33 : vector<16x4032xi32>
    %cst = arith.constant 0.000000e+00 : bf16
    %35 = vector.broadcast %cst : bf16 to vector<16x4032xbf16>
    %36 = arith.select %34, %0, %35 : vector<16x4032xi1>, vector<16x4032xbf16>
    %c0_7 = arith.constant 0 : index
    %c0_8 = arith.constant 0 : index
    %37 = vector.load %arg3[%c0_7, %c0_8] : memref<4032x128xbf16, #tpu.memory_space<vmem>>, vector<4032x128xbf16>
    %cst_9 = arith.constant dense<0.000000e+00> : vector<16x128xf32>
    %38 = tpu.matmul %36, %37, %cst_9 {dimension_numbers = #tpu.dot_dimension_numbers<[1], [0], [0], [1], [0, 0, 1, 1], [], []>} : vector<16x4032xbf16>, vector<4032x128xbf16>, vector<16x128xf32> -> vector<16x128xf32>
    %c0_10 = arith.constant 0 : index
    %c0_11 = arith.constant 0 : index
    %39 = vector.load %arg4[%c0_10, %c0_11] : memref<1x128xf32, #tpu.memory_space<vmem>>, vector<1x128xf32>
    %40 = vector.broadcast %39 : vector<1x128xf32> to vector<16x128xf32>
    %41 = arith.addf %38, %40 : vector<16x128xf32>
    %c0_12 = arith.constant 0 : index
    %c0_13 = arith.constant 0 : index
    %42 = vector.load %arg5[%c0_12, %c0_13] : memref<16x128xf32, #tpu.memory_space<vmem>>, vector<16x128xf32>
    tpu.vector_store %arg5[%c0_12, %c0_13], %41 {strides = array<i32>} : memref<16x128xf32, #tpu.memory_space<vmem>>, vector<16x128xf32>,
    return
  }
  func.func @transform_0(%arg0: i32) -> i32 {
    %c0_i32 = arith.constant 0 : i32
    %c0_i32_0 = arith.constant 0 : i32
    return %c0_i32 : i32
  }
  func.func @transform_1(%arg0: i32) -> (i32, i32) {
    %c0_i32 = arith.constant 0 : i32
    %c0_i32_0 = arith.constant 0 : i32
    return %arg0, %c0_i32 : i32, i32
  }
  func.func @transform_2(%arg0: i32) -> (i32, i32) {
    %c0_i32 = arith.constant 0 : i32
    %c0_i32_0 = arith.constant 0 : i32
    %c0_i32_1 = arith.constant 0 : i32
    return %c0_i32, %c0_i32_0 : i32, i32
  }
  func.func @transform_3(%arg0: i32) -> (i32, i32) {
    %c0_i32 = arith.constant 0 : i32
    %c0_i32_0 = arith.constant 0 : i32
    %c0_i32_1 = arith.constant 0 : i32
    return %c0_i32, %c0_i32_0 : i32, i32
  }
  func.func @transform_4(%arg0: i32) -> (i32, i32) {
    %c0_i32 = arith.constant 0 : i32
    %c0_i32_0 = arith.constant 0 : i32
    return %arg0, %c0_i32 : i32, i32
  }
}

</mosaic_0001>

<bundles_post_ra>
// kernel: tpu_custom_call.1
= control target key start
LH: loop header
LB: loop body
LE: loop exit
PB: predicated region body
PF: predicated region fallthrough
CT: control target
= control target key end

     0   :  { %10 = vsyncpa [#allocation4], 0  ;;  %s4710_s0 = inlined_call_operand.<no memory space> [shape: s32[1], index: 0, kind: input, shape index: {}]   ;;  %s4711_s1 = inlined_call_operand.hbm [shape: bf16[8,4032], index: 1, kind: input, shape index: {}]   ;;  %s4712_s2 = inlined_call_operand.hbm [shape: bf16[4032,128], index: 2, kind: input, shape index: {}]   ;;  %s4713_s3 = inlined_call_operand.vmem [shape: f32[1,128], index: 3, kind: input, shape index: {}]   ;;  %s4714_s4 = inlined_call_operand.hbm [shape: f32[8,128], index: 4, kind: output, shape index: {}]  }
   0x1   :  { %11 = vsyncpa [#allocation7], 0 }
   0x2   :  { %12 = vsyncpa [#allocation5], 0 }
   0x3   :  { %19 = vsyncadd [#allocation4], 2048  ;;  %s4396_s15 = smov [#allocation3]   ;;  %s4324_s19 = scalar_lea.hbm %s4711_s1, 2048 }
   0x4   :  { %s20_s16 = sshll.u32 %s4396_s15, 4  ;;  %p4325_p0 = scmp.ne.s32.totalorder %s4711_s1, %s4324_s19  ;;  %s21_s16 = int_to_ptr.vmem [resolvable:$true] %s20_s16 }
   0x5   :  { %p4328_p1 = scmp.lt.u32.totalorder %s4324_s19, %s4711_s1 }
   0x7   :  { %p4330_p2 = pnand %p4328_p1, %p4325_p0 }
   0x9   :  { %4333 = shalt.err (!%p4330_p2)
}
   0xa   :  { %s4334_s24 = scalar_lea.vmem %s21_s16, 2048  ;;  %s4338_s25 = scalar_lea.vmem %s21_s16, 4096 }
   0xb   :  { %p4335_p3 = scmp.ne.s32.totalorder %s21_s16, %s4334_s24  ;;  %p4339_p4 = scmp.lt.s32.totalorder %s21_s16, %s21_s16 }
   0xc   :  { %p4340_p5 = scmp.lt.s32.totalorder %s4338_s25, %s4334_s24 }
   0xe   :  { %p4341_p6 = por %p4340_p5, %p4339_p4 }
  0x10   :  { %p4342_p7 = pnand %p4341_p6, %p4335_p3 }
  0x12   :  { %4345 = shalt.err (!%p4342_p7)
}
  0x13   :  { %s4397_s26 = smov 2048   ;;  %s4398_s27 = smov 128  }
  0x14   :  { %26 = dma.hbm_to_vmem [thread:$0]  %s4711_s1, 2048, %s21_s16, [#allocation4], %s4397_s26, %s4397_s26, %s4398_s27  }
  0x15   :  { %s4399_s30 = smov [#allocation6]   ;;  %s4346_s8 = scalar_lea.hbm %s4712_s2, 32256 }
  0x16   :  { %s32_s5 = sshll.u32 %s4399_s30, 4  ;;  %p4347_p8 = scmp.ne.s32.totalorder %s4712_s2, %s4346_s8  ;;  %s33_s5 = int_to_ptr.vmem [resolvable:$true] %s32_s5 }
  0x17   :  { %p4350_p9 = scmp.lt.u32.totalorder %s4346_s8, %s4712_s2 }
  0x19   :  { %p4352_p10 = pnand %p4350_p9, %p4347_p8 }
  0x1b   :  { %4355 = shalt.err (!%p4352_p10)
}
  0x1c   :  { %s4356_s13 = scalar_lea.vmem %s33_s5, 32256  ;;  %p4361_p12 = scmp.lt.s32.totalorder %s33_s5, %s33_s5 }
  0x1d   :  { %p4357_p11 = scmp.ne.s32.totalorder %s33_s5, %s4356_s13  ;;  %p4362_p13 = scmp.lt.s32.totalorder %s4356_s13, %s4356_s13 }
  0x1f   :  { %p4363_p0 = por %p4362_p13, %p4361_p12 }
  0x21   :  { %p4364_p1 = pnand %p4363_p0, %p4357_p11 }
  0x23   :  { %4367 = shalt.err (!%p4364_p1)
}
  0x24   :  { %s4400_s1 = smov 64   ;;  %s4401_s14 = smov 4  }
  0x25   :  { %38 = dma.hbm_to_vmem [thread:$0]  %s4712_s2, 32256, %s33_s5, [#allocation7], %s4400_s1, %s4400_s1, %s4401_s14  }
  0x26   :  { %4390 = dma.done.wait [#allocation4], 4096  }
  0x27   :  { %4391 = vsyncadd [#allocation4], 4294963200 }
  0x28   :  { %4392 = dma.done.wait [#allocation7], 32256  }
  0x29   :  { %4393 = vsyncadd [#allocation7], 4294935040  ;;  %v81_v0 = vlaneseq  ;;  %s121_s19 = smul.u32 179424673, %s4710_s0  ;;  %v4072_v9 = vld [vmem:[#allocation6 + $0x40] sm:$0xff]   ;;  %v4076_v13 = vld [vmem:[#allocation6 + $0x48] sm:$0xff]  }
  0x2a   :  { %v4073_v10 = vld [vmem:[#allocation6 + $0xc0] sm:$0xff]   ;;  %3733 = vmatprep.subr.bf16.mxu0 %v4072_v9  ;;  %v4077_v14 = vld [vmem:[#allocation6 + $0xc8] sm:$0xff]   ;;  %v4080_v17 = vld [vmem:[#allocation6 + $0x50] sm:$0xff]  }
  0x2b   :  { %v82_v1 = vshrl.u32 %v81_v0, 7  ;;  %v4458_v2 = vand.u32 127, %v81_v0  ;;  %v4460_v3 = vstv %s121_s19  ;;  %v4074_v11 = vld [vmem:[#allocation6] sm:$0xff]   ;;  %3755 = vmatprep.subr.bf16.mxu1 %v4073_v10  ;;  %v4078_v15 = vld [vmem:[#allocation6 + $0x8] sm:$0xff]   ;;  %v4081_v18 = vld [vmem:[#allocation6 + $0xd0] sm:$0xff]  }
  0x2c   :  { %v4075_v12 = vld [vmem:[#allocation6 + $0x80] sm:$0xff]   ;;  %3734 = vmatpush3.bf16.msra.mxu0 %v4074_v11  ;;  %v4079_v16 = vld [vmem:[#allocation6 + $0x88] sm:$0xff]   ;;  %v4082_v19 = vld [vmem:[#allocation6 + $0x10] sm:$0xff]  }
  0x2d   :  { %v4463_v4 = vadd.s32 128, %v4458_v2  ;;  %v4466_v5 = vadd.s32 %v4460_v3, %v82_v1  ;;  %v135_v6 = vmul.u32 2654435769, %v4458_v2  ;;  %3756 = vmatpush3.bf16.msra.mxu1 %v4075_v12  ;;  %3735 = vmatprep.subr.bf16.mxu0 %v4076_v13  ;;  %v4083_v20 = vld [vmem:[#allocation6 + $0x90] sm:$0xff]   ;;  %v4084_v21 = vld [vmem:[#allocation6 + $0x58] sm:$0xff]   ;;  %v4088_v25 = vld [vmem:[#allocation6 + $0x60] sm:$0xff]  }
  0x2e   :  { %3757 = vmatprep.subr.bf16.mxu1 %v4077_v14  ;;  %v4085_v22 = vld [vmem:[#allocation6 + $0xd8] sm:$0xff]   ;;  %v4089_v26 = vld [vmem:[#allocation6 + $0xe0] sm:$0xff]   ;;  %v4092_v29 = vld [vmem:[#allocation6 + $0x68] sm:$0xff]   ;;  %v83_v32 = vadd.s32 8, %v82_v1  ;;  %v90_v47 = vadd.s32 256, %v4458_v2  ;;  %v91_v49 = vadd.s32 384, %v4458_v2 }
  0x2f   :  { %v125_v7 = vmul.u32 2654435769, %v4466_v5  ;;  %v136_v8 = vmul.u32 2654435769, %v4463_v4  ;;  %v4086_v23 = vld [vmem:[#allocation6 + $0x18] sm:$0xff]   ;;  %v4090_v27 = vld [vmem:[#allocation6 + $0x20] sm:$0xff]  }
  0x30   :  { %3736 = vmatpush3.bf16.msra.mxu0 %v4078_v15  ;;  %v4087_v24 = vld [vmem:[#allocation6 + $0x98] sm:$0xff]   ;;  %v4091_v28 = vld [vmem:[#allocation6 + $0xa0] sm:$0xff]   ;;  %v4093_v30 = vld [vmem:[#allocation6 + $0xe8] sm:$0xff]   ;;  %v3415_v34 = vshrl.u32 %v135_v6, 16  ;;  %v124_v42 = vadd.s32 %v4460_v3, %v83_v32  ;;  %v137_v56 = vmul.u32 2654435769, %v90_v47 }
  0x31   :  { %3758 = vmatpush3.bf16.msra.mxu1 %v4079_v16  ;;  %3737 = vmatprep.subr.bf16.mxu0 %v4080_v17  ;;  %v4094_v31 = vld [vmem:[#allocation6 + $0x28] sm:$0xff]   ;;  %v4096_v35 = vld [vmem:[#allocation6 + $0x70] sm:$0xff]   ;;  %v3413_v36 = vshrl.u32 %v125_v7, 16  ;;  %v3416_v38 = vshrl.u32 %v136_v8, 16  ;;  %v4100_v41 = vld [vmem:[#allocation6 + $0x78] sm:$0xff]   ;;  %v92_v32 = vadd.s32 512, %v4458_v2 }
  0x32   :  { %3759 = vmatprep.subr.bf16.mxu1 %v4081_v18  ;;  %v4095_v33 = vld [vmem:[#allocation6 + $0xa8] sm:$0xff]   ;;  %v4097_v37 = vld [vmem:[#allocation6 + $0xf0] sm:$0xff]   ;;  %v4101_v44 = vld [vmem:[#allocation6 + $0xf8] sm:$0xff]   ;;  %v231_v45 = vxor.u32 %v3415_v34, %v135_v6  ;;  %v126_v51 = vmul.u32 2654435769, %v124_v42  ;;  %v3417_v62 = vshrl.u32 %v137_v56, 16 }
  0x33   :  { %v4098_v39 = vld [vmem:[#allocation6 + $0x30] sm:$0xff]   ;;  %v131_v43 = vxor.u32 %v3413_v36, %v125_v7  ;;  %v232_v46 = vxor.u32 %v3416_v38, %v136_v8  ;;  %v4102_v48 = vld [vmem:[#allocation6 + $0x38] sm:$0xff]   ;;  %v138_v57 = vmul.u32 2654435769, %v91_v49  ;;  %v4104_v58 = vld [vmem:[#allocation6 + $0x140] sm:$0xff]  }
  0x34   :  { %3738 = vmatpush3.bf16.msra.mxu0 %v4082_v19  ;;  %v4099_v40 = vld [vmem:[#allocation6 + $0xb0] sm:$0xff]   ;;  %v4103_v50 = vld [vmem:[#allocation6 + $0xb8] sm:$0xff]   ;;  %v263_v53 = vmul.u32 2246822507, %v231_v45  ;;  %v3414_v55 = vshrl.u32 %v126_v51, 16  ;;  %v4105_v0 = vld [vmem:[#allocation6 + $0x1c0] sm:$0xff]   ;;  %v233_v5 = vxor.u32 %v3417_v62, %v137_v56 }
  0x35   :  { %3760 = vmatpush3.bf16.msra.mxu1 %v4083_v20  ;;  %3739 = vmatprep.subr.bf16.mxu0 %v4084_v21  ;;  %v4486_v52 = vmul.u32 2246822507, %v131_v43  ;;  %v264_v54 = vmul.u32 2246822507, %v232_v46  ;;  %v3418_v63 = vshrl.u32 %v138_v57, 16  ;;  %v48_v7 = vld [vmem:[#allocation3] sm:$0xff] }
  0x36   :  { %3761 = vmatprep.subr.bf16.mxu1 %v4085_v22  ;;  %v132_v61 = vxor.u32 %v3414_v55, %v126_v51  ;;  %v265_v10 = vmul.u32 2246822507, %v233_v5  ;;  %v64_v12 = vld [vmem:[#allocation3 + $0x80] sm:$0xff]  ;;  %v49_v18 = vld [vmem:[#allocation3 + $0x8] sm:$0xff]  ;;  %v4113_v42 = vld [vmem:[#allocation6 + $0x1d0] sm:$0xff]   ;;  %v95_v62 = vadd.s32 896, %v4458_v2 }
  0x37   :  { %v295_v59 = vxor.u32 %v263_v53, %v4486_v52  ;;  %v296_v60 = vxor.u32 %v264_v54, %v4486_v52  ;;  %v234_v6 = vxor.u32 %v3418_v63, %v138_v57  ;;  %v65_v21 = vld [vmem:[#allocation3 + $0x88] sm:$0xff]  ;;  %v4107_v34 = vld [vmem:[#allocation6 + $0x180] sm:$0xff]   ;;  %v4114_v43 = vld [vmem:[#allocation6 + $0x110] sm:$0xff]  }
  0x38   :  { %3740 = vmatpush3.bf16.msra.mxu0 %v4086_v23  ;;  %v4490_v4 = vmul.u32 2246822507, %v132_v61  ;;  %v297_v15 = vxor.u32 %v265_v10, %v4486_v52  ;;  %v4110_v38 = vld [vmem:[#allocation6 + $0x108] sm:$0xff]   ;;  %v4115_v45 = vld [vmem:[#allocation6 + $0x190] sm:$0xff]   ;;  %v4117_v46 = vld [vmem:[#allocation6 + $0x1d8] sm:$0xff]   ;;  %v94_v61 = vadd.s32 768, %v4458_v2 }
  0x39   :  { %3762 = vmatpush3.bf16.msra.mxu1 %v4087_v24  ;;  %3741 = vmatprep.subr.bf16.mxu0 %v4088_v25  ;;  %v359_v1 = vmul.u32 3266489909, %v295_v59  ;;  %v360_v3 = vmul.u32 3266489909, %v296_v60  ;;  %v4118_v47 = vld [vmem:[#allocation6 + $0x118] sm:$0xff]   ;;  %v4122_v51 = vld [vmem:[#allocation6 + $0x120] sm:$0xff]  }
  0x3a   :  { %3763 = vmatprep.subr.bf16.mxu1 %v4089_v26  ;;  %v327_v8 = vxor.u32 %v263_v53, %v4490_v4  ;;  %v328_v9 = vxor.u32 %v264_v54, %v4490_v4  ;;  %v266_v11 = vmul.u32 2246822507, %v234_v6  ;;  %v329_v19 = vxor.u32 %v265_v10, %v4490_v4  ;;  %v4119_v49 = vld [vmem:[#allocation6 + $0x198] sm:$0xff]   ;;  %v4124_v53 = vld [vmem:[#allocation6 + $0x168] sm:$0xff]   ;;  %v4123_v55 = vld [vmem:[#allocation6 + $0x1a0] sm:$0xff]  }
  0x3b   :  { %vm423_vm0 = vcmp.ge.s32.totalorder %v359_v1, 0  ;;  %vm424_vm1 = vcmp.ge.s32.totalorder %v360_v3, 0  ;;  %v361_v22 = vmul.u32 3266489909, %v297_v15  ;;  %v4125_v56 = vld [vmem:[#allocation6 + $0x1e8] sm:$0xff]   ;;  %v4128_v59 = vld [vmem:[#allocation6 + $0x170] sm:$0xff]  }
  0x3c   :  { %3742 = vmatpush3.bf16.msra.mxu0 %v4090_v27  ;;  %vm487_vm2 = vmpackc.low %vm424_vm1, %vm423_vm0  ;;  %v391_v13 = vmul.u32 3266489909, %v327_v8  ;;  %v392_v14 = vmul.u32 3266489909, %v328_v9  ;;  %v298_v16 = vxor.u32 %v266_v11, %v4486_v52  ;;  %v330_v20 = vxor.u32 %v266_v11, %v4490_v4  ;;  %v4106_v27 = vld [vmem:[#allocation6 + $0x100] sm:$0xff]   ;;  %v4126_v57 = vld [vmem:[#allocation6 + $0x128] sm:$0xff]  }
  0x3d   :  { %3764 = vmatpush3.bf16.msra.mxu1 %v4091_v28  ;;  %3743 = vmatprep.subr.bf16.mxu0 %v4092_v29  ;;  %v519_v17 = vsel %vm487_vm2, %v48_v7, 0  ;;  %v393_v24 = vmul.u32 3266489909, %v329_v19  ;;  %vm425_vm6 = vcmp.ge.s32.totalorder %v361_v22, 0  ;;  %v4127_v63 = vld [vmem:[#allocation6 + $0x1a8] sm:$0xff]   ;;  %v4130_v1 = vld [vmem:[#allocation6 + $0x130] sm:$0xff]  }
  0x3e   :  { %3765 = vmatprep.subr.bf16.mxu1 %v4093_v30  ;;  %vm455_vm3 = vcmp.ge.s32.totalorder %v391_v13, 0  ;;  %vm456_vm4 = vcmp.ge.s32.totalorder %v392_v14, 0  ;;  %v362_v23 = vmul.u32 3266489909, %v298_v16  ;;  %v394_v25 = vmul.u32 3266489909, %v330_v20 }
  0x3f   :  { %vm503_vm5 = vmpackc.low %vm456_vm4, %vm455_vm3  ;;  %vm457_vm8 = vcmp.ge.s32.totalorder %v393_v24, 0  ;;  %v4131_v5 = vld [vmem:[#allocation6 + $0x1b0] sm:$0xff]   ;;  %v4132_v6 = vld [vmem:[#allocation6 + $0x178] sm:$0xff]   ;;  %v141_v10 = vmul.u32 2654435769, %v94_v61 }
  0x40   :  { %3744 = vmatpush3.bf16.msra.mxu0 %v4094_v31  ;;  %v535_v26 = vsel %vm503_vm5, %v64_v12, 0  ;;  %vm426_vm7 = vcmp.ge.s32.totalorder %v362_v23, 0  ;;  %vm458_vm9 = vcmp.ge.s32.totalorder %v394_v25, 0  ;;  %v4108_v31 = vld [vmem:[#allocation6 + $0x148] sm:$0xff]   ;;  %v4133_v8 = vld [vmem:[#allocation6 + $0x1f8] sm:$0xff]  }
  0x41   :  { %3766 = vmatpush3.bf16.msra.mxu1 %v4095_v33  ;;  %3745 = vmatprep.subr.bf16.mxu0 %v4096_v35  ;;  %v3448_v28 = vcombine.low %v519_v17, %v535_v26  ;;  %v3449_v29 = vcombine.high %v519_v17, %v535_v26  ;;  %vm488_vm10 = vmpackc.low %vm426_vm7, %vm425_vm6  ;;  %v142_v11 = vmul.u32 2654435769, %v95_v62  ;;  %v4134_v14 = vld [vmem:[#allocation6 + $0x138] sm:$0xff]   ;;  %v3421_v16 = vshrl.u32 %v141_v10, 16  ;;  %v4143_v61 = vld [vmem:[#allocation6 + $0x288] sm:$0xff]  }
  0x42   :  { %3767 = vmatprep.subr.bf16.mxu1 %v4097_v37  ;;  %vm504_vm11 = vmpackc.low %vm458_vm9, %vm457_vm8  ;;  %v520_v30 = vsel %vm488_vm10, %v49_v18, 0  ;;  %v4109_v37 = vld [vmem:[#allocation6 + $0x1c8] sm:$0xff]   ;;  %v4136_v18 = vld [vmem:[#allocation6 + $0x240] sm:$0xff]  }
  0x43   :  { %2769 = vmatprep.mubr.bf16.mxu0 %v3449_v29  ;;  %v536_v33 = vsel %vm504_vm11, %v65_v21, 0  ;;  %v3422_v17 = vshrl.u32 %v142_v11, 16  ;;  %v237_v22 = vxor.u32 %v3421_v16, %v141_v10  ;;  %v4135_v24 = vld [vmem:[#allocation6 + $0x1b8] sm:$0xff]   ;;  %v4145_v62 = vld [vmem:[#allocation6 + $0x2d0] sm:$0xff]   ;;  %v4156_v10 = vld [vmem:[#allocation6 + $0x268] sm:$0xff]   ;;  %v98_v16 = vadd.s32 1280, %v4458_v2 }
  0x44   :  { %3746 = vmatpush3.bf16.msra.mxu0 %v4098_v39  ;;  %v3450_v35 = vcombine.low %v520_v30, %v536_v33  ;;  %v3451_v36 = vcombine.high %v520_v30, %v536_v33  ;;  %v4111_v39 = vld [vmem:[#allocation6 + $0x188] sm:$0xff]   ;;  %v66_v33 = vld [vmem:[#allocation3 + $0x90] sm:$0xff] }
  0x45   :  { %3768 = vmatpush3.bf16.msra.mxu1 %v4099_v40  ;;  %3747 = vmatprep.subr.bf16.mxu0 %v4100_v41  ;;  %v4112_v40 = vld [vmem:[#allocation6 + $0x150] sm:$0xff]   ;;  %v139_v41 = vmul.u32 2654435769, %v92_v32  ;;  %v238_v23 = vxor.u32 %v3422_v17, %v142_v11  ;;  %v269_v30 = vmul.u32 2246822507, %v237_v22  ;;  %v4155_v11 = vld [vmem:[#allocation6 + $0x2a0] sm:$0xff]  }
  0x46   :  { %3769 = vmatprep.subr.bf16.mxu1 %v4101_v44  ;;  %2810 = vmatprep.mubr.bf16.mxu1 %v3451_v36  ;;  %v4116_v44 = vld [vmem:[#allocation6 + $0x158] sm:$0xff]   ;;  %v50_v32 = vld [vmem:[#allocation3 + $0x10] sm:$0xff]  ;;  %v145_v26 = vmul.u32 2654435769, %v98_v16 }
  0x47   :  { %v3419_v54 = vshrl.u32 %v139_v41, 16  ;;  %v301_v36 = vxor.u32 %v269_v30, %v4486_v52  ;;  %v4160_v17 = vld [vmem:[#allocation6 + $0x270] sm:$0xff]  }
  0x48   :  { %3748 = vmatpush3.bf16.msra.mxu0 %v4102_v48  ;;  %v4120_v48 = vld [vmem:[#allocation6 + $0x160] sm:$0xff]  }
  0x49   :  { %3770 = vmatpush3.bf16.msra.mxu1 %v4103_v50  ;;  %3777 = vmatprep.subr.bf16.mxu0 %v4104_v58  ;;  %v4121_v50 = vld [vmem:[#allocation6 + $0x1e0] sm:$0xff]   ;;  %v93_v58 = vadd.s32 640, %v4458_v2  ;;  %v235_v60 = vxor.u32 %v3419_v54, %v139_v41  ;;  %v365_v41 = vmul.u32 3266489909, %v301_v36  ;;  %v4140_v54 = vld [vmem:[#allocation6 + $0x248] sm:$0xff]  }
  0x4a   :  { %3799 = vmatprep.subr.bf16.mxu1 %v4105_v0  ;;  %v4129_v0 = vld [vmem:[#allocation6 + $0x1f0] sm:$0xff]  }
  0x4b   :  { %2770 = vmatmul.mubr.bf16.vlgmr.msra.gmra.mrb[0].mxu0 %v3448_v28  ;;  %v140_v3 = vmul.u32 2654435769, %v93_v58  ;;  %v267_v7 = vmul.u32 2246822507, %v235_v60  ;;  %vm429_vm2 = vcmp.ge.s32.totalorder %v365_v41, 0  ;;  %v4141_v58 = vld [vmem:[#allocation6 + $0x2c8] sm:$0xff]  }
  0x4c   :  { %3778 = vmatpush3.bf16.msra.mxu0 %v4106_v27  ;;  %2811 = vmatmul.mubr.bf16.vlgmr.msra.gmra.mrb[0].mxu1 %v3450_v35  ;;  %v4137_v27 = vld [vmem:[#allocation6 + $0x2c0] sm:$0xff]   ;;  %v4144_v60 = vld [vmem:[#allocation6 + $0x250] sm:$0xff]  }
  0x4d   :  { %3779 = vmatprep.subr.bf16.mxu0 %v4108_v31  ;;  %3800 = vmatpush3.bf16.msra.mxu1 %v4107_v34  ;;  %v3420_v9 = vshrl.u32 %v140_v3, 16  ;;  %v299_v12 = vxor.u32 %v267_v7, %v4486_v52  ;;  %v331_v13 = vxor.u32 %v267_v7, %v4490_v4  ;;  %v270_v31 = vmul.u32 2246822507, %v238_v23  ;;  %v4151_v7 = vld [vmem:[#allocation6 + $0x298] sm:$0xff]   ;;  %v4163_v23 = vld [vmem:[#allocation6 + $0x2b0] sm:$0xff]   ;;  %v4169_v41 = vld [vmem:[#allocation6 + $0x3c0] sm:$0xff]  }
  0x4e   :  { %3801 = vmatprep.subr.bf16.mxu1 %v4109_v37 }
  0x4f   :  { %v236_v15 = vxor.u32 %v3420_v9, %v140_v3  ;;  %v363_v19 = vmul.u32 3266489909, %v299_v12  ;;  %v395_v20 = vmul.u32 3266489909, %v331_v13  ;;  %v302_v37 = vxor.u32 %v270_v31, %v4486_v52  ;;  %v4149_v3 = vld [vmem:[#allocation6 + $0x2d8] sm:$0xff]   ;;  %v4154_v9 = vld [vmem:[#allocation6 + $0x220] sm:$0xff]  }
  0x50   :  { %3780 = vmatpush3.bf16.msra.mxu0 %v4110_v38  ;;  %v51_v38 = vld [vmem:[#allocation3 + $0x18] sm:$0xff]  ;;  %v96_v12 = vadd.s32 1024, %v4458_v2  ;;  %v4157_v13 = vld [vmem:[#allocation6 + $0x2e8] sm:$0xff]  }
  0x51   :  { %3781 = vmatprep.subr.bf16.mxu0 %v4112_v40  ;;  %3802 = vmatpush3.bf16.msra.mxu1 %v4111_v39  ;;  %v268_v21 = vmul.u32 2246822507, %v236_v15  ;;  %vm4504_vm12 = vcmp.ge.s32.totalorder %v363_v19, 0  ;;  %vm4508_vm13 = vcmp.ge.s32.totalorder %v395_v20, 0  ;;  %v333_v39 = vxor.u32 %v269_v30, %v4490_v4  ;;  %v4158_v15 = vld [vmem:[#allocation6 + $0x228] sm:$0xff]   ;;  %v4161_v20 = vld [vmem:[#allocation6 + $0x2f0] sm:$0xff]  }
  0x52   :  { %3803 = vmatprep.subr.bf16.mxu1 %v4113_v42  ;;  %v334_v40 = vxor.u32 %v270_v31, %v4490_v4  ;;  %v366_v42 = vmul.u32 3266489909, %v302_v37  ;;  %v4159_v19 = vld [vmem:[#allocation6 + $0x2a8] sm:$0xff]   ;;  %v143_v22 = vmul.u32 2654435769, %v96_v12  ;;  %v3425_v31 = vshrl.u32 %v145_v26, 16 }
  0x53   :  { %v300_v28 = vxor.u32 %v268_v21, %v4486_v52  ;;  %v332_v29 = vxor.u32 %v268_v21, %v4490_v4  ;;  %v4162_v21 = vld [vmem:[#allocation6 + $0x230] sm:$0xff]   ;;  %v4171_v12 = vld [vmem:[#allocation6 + $0x380] sm:$0xff]  }
  0x54   :  { %3782 = vmatpush3.bf16.msra.mxu0 %v4114_v43  ;;  %v397_v43 = vmul.u32 3266489909, %v333_v39  ;;  %vm430_vm3 = vcmp.ge.s32.totalorder %v366_v42, 0  ;;  %v241_v37 = vxor.u32 %v3425_v31, %v145_v26  ;;  %v4179_v26 = vld [vmem:[#allocation6 + $0x390] sm:$0xff]   ;;  %v4185_v31 = vld [vmem:[#allocation6 + $0x3e0] sm:$0xff]  }
  0x55   :  { %3783 = vmatprep.subr.bf16.mxu0 %v4116_v44  ;;  %3804 = vmatpush3.bf16.msra.mxu1 %v4115_v45  ;;  %v364_v34 = vmul.u32 3266489909, %v300_v28  ;;  %v396_v35 = vmul.u32 3266489909, %v332_v29  ;;  %vm490_vm6 = vmpackc.low %vm430_vm3, %vm429_vm2  ;;  %v3423_v28 = vshrl.u32 %v143_v22, 16 }
  0x56   :  { %3805 = vmatprep.subr.bf16.mxu1 %v4117_v46  ;;  %v398_v44 = vmul.u32 3266489909, %v334_v40  ;;  %v67_v46 = vld [vmem:[#allocation3 + $0x98] sm:$0xff]  ;;  %vm461_vm4 = vcmp.ge.s32.totalorder %v397_v43, 0  ;;  %v4168_v40 = vld [vmem:[#allocation6 + $0x340] sm:$0xff]  }
  0x57   :  { %vm428_vm14 = vcmp.ge.s32.totalorder %v364_v34, 0  ;;  %vm460_vm15 = vcmp.ge.s32.totalorder %v396_v35, 0  ;;  %v4167_v35 = vld [vmem:[#allocation6 + $0x2b8] sm:$0xff]   ;;  %v273_v43 = vmul.u32 2246822507, %v241_v37  ;;  %v4189_v37 = vld [vmem:[#allocation6 + $0x3e8] sm:$0xff]  }
  0x58   :  { %3784 = vmatpush3.bf16.msra.mxu0 %v4118_v47  ;;  %vm489_vm0 = vmpackc.low %vm428_vm14, %vm4504_vm12  ;;  %vm462_vm5 = vcmp.ge.s32.totalorder %v398_v44, 0 }
  0x59   :  { %3785 = vmatprep.subr.bf16.mxu0 %v4120_v48  ;;  %3806 = vmatpush3.bf16.msra.mxu1 %v4119_v49  ;;  %vm505_vm1 = vmpackc.low %vm460_vm15, %vm4508_vm13  ;;  %v521_v45 = vsel %vm489_vm0, %v50_v32, 0  ;;  %v4138_v48 = vld [vmem:[#allocation6 + $0x200] sm:$0xff]   ;;  %v4166_v32 = vld [vmem:[#allocation6 + $0x238] sm:$0xff]  }
  0x5a   :  { %3807 = vmatprep.subr.bf16.mxu1 %v4121_v50  ;;  %v537_v47 = vsel %vm505_vm1, %v66_v33, 0  ;;  %vm506_vm7 = vmpackc.low %vm462_vm5, %vm461_vm4  ;;  %v239_v33 = vxor.u32 %v3423_v28, %v143_v22  ;;  %v4177_v22 = vld [vmem:[#allocation6 + $0x3d0] sm:$0xff]   ;;  %v4182_v28 = vld [vmem:[#allocation6 + $0x318] sm:$0xff]  }
  0x5b   :  { %v3452_v49 = vcombine.low %v521_v45, %v537_v47  ;;  %v3453_v50 = vcombine.high %v521_v45, %v537_v47 }
  0x5c   :  { %3786 = vmatpush3.bf16.msra.mxu0 %v4122_v51  ;;  %v522_v51 = vsel %vm490_vm6, %v51_v38, 0  ;;  %v271_v38 = vmul.u32 2246822507, %v239_v33  ;;  %v4186_v33 = vld [vmem:[#allocation6 + $0x320] sm:$0xff]  }
  0x5d   :  { %3787 = vmatprep.subr.bf16.mxu0 %v4124_v53  ;;  %3808 = vmatpush3.bf16.msra.mxu1 %v4123_v55  ;;  %v538_v53 = vsel %vm506_vm7, %v67_v46, 0 }
  0x5e   :  { %3809 = vmatprep.subr.bf16.mxu1 %v4125_v56  ;;  %2851 = vmatprep.mubr.bf16.mxu0 %v3453_v50  ;;  %v3454_v55 = vcombine.low %v522_v51, %v538_v53  ;;  %v3455_v56 = vcombine.high %v522_v51, %v538_v53  ;;  %v303_v44 = vxor.u32 %v271_v38, %v4486_v52 }
  0x5f   :  { %v335_v45 = vxor.u32 %v271_v38, %v4490_v4  ;;  %v337_v50 = vxor.u32 %v273_v43, %v4490_v4 }
  0x60   :  { %3788 = vmatpush3.bf16.msra.mxu0 %v4126_v57  ;;  %v4139_v57 = vld [vmem:[#allocation6 + $0x280] sm:$0xff]   ;;  %2892 = vmatprep.mubr.bf16.mxu1 %v3455_v56  ;;  %v367_v51 = vmul.u32 3266489909, %v303_v44  ;;  %v4193_v44 = vld [vmem:[#allocation6 + $0x3f0] sm:$0xff]  }
  0x61   :  { %3789 = vmatprep.subr.bf16.mxu0 %v4128_v59  ;;  %3810 = vmatpush3.bf16.msra.mxu1 %v4127_v63  ;;  %v4142_v59 = vld [vmem:[#allocation6 + $0x208] sm:$0xff]   ;;  %v4146_v63 = vld [vmem:[#allocation6 + $0x210] sm:$0xff]   ;;  %v399_v53 = vmul.u32 3266489909, %v335_v45  ;;  %v52_v56 = vld [vmem:[#allocation3 + $0x20] sm:$0xff] }
  0x62   :  { %3811 = vmatprep.subr.bf16.mxu1 %v4129_v0  ;;  %v4148_v0 = vld [vmem:[#allocation6 + $0x258] sm:$0xff]   ;;  %vm4534_vm8 = vcmp.ge.s32.totalorder %v367_v51, 0 }
  0x63   :  { %vm4538_vm9 = vcmp.ge.s32.totalorder %v399_v53, 0  ;;  %v4196_v51 = vld [vmem:[#allocation6 + $0x378] sm:$0xff]  }
  0x64   :  { %3790 = vmatpush3.bf16.msra.mxu0 %v4130_v1  ;;  %v4147_v1 = vld [vmem:[#allocation6 + $0x290] sm:$0xff]  }
  0x65   :  { %3791 = vmatprep.subr.bf16.mxu0 %v4132_v6  ;;  %3812 = vmatpush3.bf16.msra.mxu1 %v4131_v5  ;;  %v4150_v5 = vld [vmem:[#allocation6 + $0x218] sm:$0xff]   ;;  %v4152_v6 = vld [vmem:[#allocation6 + $0x260] sm:$0xff]  }
  0x66   :  { %3813 = vmatprep.subr.bf16.mxu1 %v4133_v8  ;;  %v4153_v8 = vld [vmem:[#allocation6 + $0x2e0] sm:$0xff]  }
  0x68   :  { %3792 = vmatpush3.bf16.msra.mxu0 %v4134_v14  ;;  %v97_v14 = vadd.s32 1152, %v4458_v2 }
  0x69   :  { %3821 = vmatprep.subr.bf16.mxu0 %v4136_v18  ;;  %3814 = vmatpush3.bf16.msra.mxu1 %v4135_v24  ;;  %v99_v18 = vadd.s32 1408, %v4458_v2  ;;  %v4164_v24 = vld [vmem:[#allocation6 + $0x278] sm:$0xff]  }
  0x6a   :  { %3843 = vmatprep.subr.bf16.mxu1 %v4137_v27  ;;  %v144_v25 = vmul.u32 2654435769, %v97_v14  ;;  %v4165_v27 = vld [vmem:[#allocation6 + $0x2f8] sm:$0xff]   ;;  %v4172_v14 = vld [vmem:[#allocation6 + $0x348] sm:$0xff]  }
  0x6b   :  { %2852 = vmatmul.mubr.bf16.vlgmr.msra.gmra.mrb[4].mxu0 %v3452_v49  ;;  %v146_v29 = vmul.u32 2654435769, %v99_v18  ;;  %v305_v49 = vxor.u32 %v273_v43, %v4486_v52  ;;  %v4174_v18 = vld [vmem:[#allocation6 + $0x308] sm:$0xff]  }
  0x6c   :  { %3822 = vmatpush3.bf16.msra.mxu0 %v4138_v48  ;;  %2893 = vmatmul.mubr.bf16.vlgmr.msra.gmra.mrb[4].mxu1 %v3454_v55  ;;  %v3424_v30 = vshrl.u32 %v144_v25, 16  ;;  %v4191_v43 = vld [vmem:[#allocation6 + $0x3a8] sm:$0xff]  }
  0x6d   :  { %3823 = vmatprep.subr.bf16.mxu0 %v4140_v54  ;;  %3844 = vmatpush3.bf16.msra.mxu1 %v4139_v57  ;;  %v3426_v34 = vshrl.u32 %v146_v29, 16  ;;  %v68_v57 = vld [vmem:[#allocation3 + $0xa0] sm:$0xff] }
  0x6e   :  { %3845 = vmatprep.subr.bf16.mxu1 %v4141_v58  ;;  %v240_v36 = vxor.u32 %v3424_v30, %v144_v25  ;;  %v4180_v25 = vld [vmem:[#allocation6 + $0x358] sm:$0xff]  }
  0x6f   :  { %v242_v39 = vxor.u32 %v3426_v34, %v146_v29  ;;  %v4184_v29 = vld [vmem:[#allocation6 + $0x360] sm:$0xff]   ;;  %v4183_v30 = vld [vmem:[#allocation6 + $0x398] sm:$0xff]   ;;  %v4188_v34 = vld [vmem:[#allocation6 + $0x368] sm:$0xff]  }
  0x70   :  { %3824 = vmatpush3.bf16.msra.mxu0 %v4142_v59  ;;  %v272_v42 = vmul.u32 2246822507, %v240_v36  ;;  %v101_v36 = vadd.s32 1664, %v4458_v2 }
  0x71   :  { %3825 = vmatprep.subr.bf16.mxu0 %v4144_v60  ;;  %3846 = vmatpush3.bf16.msra.mxu1 %v4143_v61  ;;  %v274_v46 = vmul.u32 2246822507, %v242_v39  ;;  %v102_v39 = vadd.s32 1792, %v4458_v2 }
  0x72   :  { %3847 = vmatprep.subr.bf16.mxu1 %v4145_v62  ;;  %v304_v47 = vxor.u32 %v272_v42, %v4486_v52  ;;  %v336_v48 = vxor.u32 %v272_v42, %v4490_v4  ;;  %v53_v62 = vld [vmem:[#allocation3 + $0x28] sm:$0xff]  ;;  %v4192_v42 = vld [vmem:[#allocation6 + $0x370] sm:$0xff]   ;;  %v148_v45 = vmul.u32 2654435769, %v101_v36 }
  0x73   :  { %v306_v54 = vxor.u32 %v274_v46, %v4486_v52  ;;  %v338_v55 = vxor.u32 %v274_v46, %v4490_v4 }
  0x74   :  { %3826 = vmatpush3.bf16.msra.mxu0 %v4146_v63  ;;  %v368_v58 = vmul.u32 3266489909, %v304_v47  ;;  %v400_v59 = vmul.u32 3266489909, %v336_v48  ;;  %v4194_v47 = vld [vmem:[#allocation6 + $0x330] sm:$0xff]   ;;  %v3428_v53 = vshrl.u32 %v148_v45, 16 }
  0x75   :  { %3827 = vmatprep.subr.bf16.mxu0 %v4148_v0  ;;  %3848 = vmatpush3.bf16.msra.mxu1 %v4147_v1  ;;  %v369_v63 = vmul.u32 3266489909, %v305_v49  ;;  %v370_v0 = vmul.u32 3266489909, %v306_v54  ;;  %v69_v1 = vld [vmem:[#allocation3 + $0xa8] sm:$0xff]  ;;  %v4195_v48 = vld [vmem:[#allocation6 + $0x3b0] sm:$0xff]  }
  0x76   :  { %3849 = vmatprep.subr.bf16.mxu1 %v4149_v3  ;;  %vm432_vm10 = vcmp.ge.s32.totalorder %v368_v58, 0  ;;  %vm464_vm11 = vcmp.ge.s32.totalorder %v400_v59, 0  ;;  %v401_v3 = vmul.u32 3266489909, %v337_v50  ;;  %v149_v49 = vmul.u32 2654435769, %v102_v39 }
  0x77   :  { %vm491_vm12 = vmpackc.low %vm432_vm10, %vm4534_vm8  ;;  %vm433_vm13 = vcmp.ge.s32.totalorder %v369_v63, 0  ;;  %vm434_vm14 = vcmp.ge.s32.totalorder %v370_v0, 0  ;;  %v4197_v58 = vld [vmem:[#allocation6 + $0x3f8] sm:$0xff]   ;;  %v244_v60 = vxor.u32 %v3428_v53, %v148_v45  ;;  %v4206_v39 = vld [vmem:[#allocation6 + $0x408] sm:$0xff]  }
  0x78   :  { %3828 = vmatpush3.bf16.msra.mxu0 %v4150_v5  ;;  %v402_v5 = vmul.u32 3266489909, %v338_v55  ;;  %vm507_vm15 = vmpackc.low %vm464_vm11, %vm4538_vm9  ;;  %vm465_vm0 = vcmp.ge.s32.totalorder %v401_v3, 0  ;;  %v4198_v59 = vld [vmem:[#allocation6 + $0x338] sm:$0xff]   ;;  %v4210_v45 = vld [vmem:[#allocation6 + $0x410] sm:$0xff]  }
  0x79   :  { %3829 = vmatprep.subr.bf16.mxu0 %v4152_v6  ;;  %3850 = vmatpush3.bf16.msra.mxu1 %v4151_v7  ;;  %v523_v6 = vsel %vm491_vm12, %v52_v56, 0  ;;  %v4170_v7 = vld [vmem:[#allocation6 + $0x300] sm:$0xff]   ;;  %vm492_vm2 = vmpackc.low %vm434_vm14, %vm433_vm13  ;;  %v3429_v56 = vshrl.u32 %v149_v49, 16  ;;  %v4199_v63 = vld [vmem:[#allocation6 + $0x3b8] sm:$0xff]   ;;  %v276_v3 = vmul.u32 2246822507, %v244_v60 }
  0x7a   :  { %3851 = vmatprep.subr.bf16.mxu1 %v4153_v8  ;;  %vm466_vm1 = vcmp.ge.s32.totalorder %v402_v5, 0  ;;  %v539_v8 = vsel %vm507_vm15, %v68_v57, 0  ;;  %v4217_v53 = vld [vmem:[#allocation6 + $0x4e0] sm:$0xff]  }
  0x7b   :  { %vm508_vm3 = vmpackc.low %vm466_vm1, %vm465_vm0  ;;  %v245_v0 = vxor.u32 %v3429_v56, %v149_v49  ;;  %v4214_v49 = vld [vmem:[#allocation6 + $0x418] sm:$0xff]   ;;  %v4220_v56 = vld [vmem:[#allocation6 + $0x468] sm:$0xff]  }
  0x7c   :  { %3830 = vmatpush3.bf16.msra.mxu0 %v4154_v9  ;;  %v3456_v9 = vcombine.low %v523_v6, %v539_v8 }
  0x7d   :  { %3831 = vmatprep.subr.bf16.mxu0 %v4156_v10  ;;  %3852 = vmatpush3.bf16.msra.mxu1 %v4155_v11  ;;  %v3457_v10 = vcombine.high %v523_v6, %v539_v8  ;;  %v524_v11 = vsel %vm492_vm2, %v53_v62, 0  ;;  %v4200_v62 = vld [vmem:[#allocation6 + $0x440] sm:$0xff]  }
  0x7e   :  { %3853 = vmatprep.subr.bf16.mxu1 %v4157_v13  ;;  %v540_v13 = vsel %vm508_vm3, %v69_v1, 0 }
  0x7f   :  { %2933 = vmatprep.mubr.bf16.mxu0 %v3457_v10  ;;  %v3459_v16 = vcombine.high %v524_v11, %v540_v13  ;;  %v308_v10 = vxor.u32 %v276_v3, %v4486_v52 }
  0x80   :  { %3832 = vmatpush3.bf16.msra.mxu0 %v4158_v15  ;;  %v3458_v15 = vcombine.low %v524_v11, %v540_v13  ;;  %v340_v11 = vxor.u32 %v276_v3, %v4490_v4  ;;  %v4225_v3 = vld [vmem:[#allocation6 + $0x4f0] sm:$0xff]  }
  0x81   :  { %3833 = vmatprep.subr.bf16.mxu0 %v4160_v17  ;;  %3854 = vmatpush3.bf16.msra.mxu1 %v4159_v19  ;;  %v4173_v17 = vld [vmem:[#allocation6 + $0x3c8] sm:$0xff]   ;;  %v100_v19 = vadd.s32 1536, %v4458_v2 }
  0x82   :  { %3855 = vmatprep.subr.bf16.mxu1 %v4161_v20  ;;  %2974 = vmatprep.mubr.bf16.mxu1 %v3459_v16  ;;  %v4175_v20 = vld [vmem:[#allocation6 + $0x388] sm:$0xff]  }
  0x84   :  { %3834 = vmatpush3.bf16.msra.mxu0 %v4162_v21  ;;  %v4176_v21 = vld [vmem:[#allocation6 + $0x350] sm:$0xff]  }
  0x85   :  { %3835 = vmatprep.subr.bf16.mxu0 %v4164_v24  ;;  %3856 = vmatpush3.bf16.msra.mxu1 %v4163_v23  ;;  %v147_v23 = vmul.u32 2654435769, %v100_v19  ;;  %v4178_v24 = vld [vmem:[#allocation6 + $0x310] sm:$0xff]   ;;  %v404_v19 = vmul.u32 3266489909, %v340_v11  ;;  %v4228_v11 = vld [vmem:[#allocation6 + $0x478] sm:$0xff]  }
  0x86   :  { %3857 = vmatprep.subr.bf16.mxu1 %v4165_v27  ;;  %v4181_v27 = vld [vmem:[#allocation6 + $0x3d8] sm:$0xff]  }
  0x87   :  { %vm468_vm7 = vcmp.ge.s32.totalorder %v404_v19, 0 }
  0x88   :  { %3836 = vmatpush3.bf16.msra.mxu0 %v4166_v32  ;;  %v3427_v32 = vshrl.u32 %v147_v23, 16 }
  0x89   :  { %3865 = vmatprep.subr.bf16.mxu0 %v4168_v40  ;;  %3858 = vmatpush3.bf16.msra.mxu1 %v4167_v35  ;;  %v4187_v35 = vld [vmem:[#allocation6 + $0x3a0] sm:$0xff]   ;;  %v4190_v40 = vld [vmem:[#allocation6 + $0x328] sm:$0xff]  }
  0x8a   :  { %3887 = vmatprep.subr.bf16.mxu1 %v4169_v41  ;;  %v243_v38 = vxor.u32 %v3427_v32, %v147_v23  ;;  %v103_v41 = vadd.s32 1920, %v4458_v2 }
  0x8b   :  { %2934 = vmatmul.mubr.bf16.vlgmr.msra.gmra.mrb[8].mxu0 %v3456_v9  ;;  %v4201_v9 = vld [vmem:[#allocation6 + $0x4c0] sm:$0xff]  }
  0x8c   :  { %3866 = vmatpush3.bf16.msra.mxu0 %v4170_v7  ;;  %2975 = vmatmul.mubr.bf16.vlgmr.msra.gmra.mrb[8].mxu1 %v3458_v15  ;;  %v275_v46 = vmul.u32 2246822507, %v243_v38  ;;  %v150_v50 = vmul.u32 2654435769, %v103_v41  ;;  %v4205_v38 = vld [vmem:[#allocation6 + $0x4c8] sm:$0xff]  }
  0x8d   :  { %3867 = vmatprep.subr.bf16.mxu0 %v4172_v14  ;;  %3888 = vmatpush3.bf16.msra.mxu1 %v4171_v12  ;;  %v277_v7 = vmul.u32 2246822507, %v245_v0  ;;  %v54_v12 = vld [vmem:[#allocation3 + $0x30] sm:$0xff]  ;;  %v4207_v41 = vld [vmem:[#allocation6 + $0x488] sm:$0xff]  }
  0x8e   :  { %3889 = vmatprep.subr.bf16.mxu1 %v4173_v17  ;;  %v307_v54 = vxor.u32 %v275_v46, %v4486_v52  ;;  %v339_v55 = vxor.u32 %v275_v46, %v4490_v4  ;;  %v3430_v57 = vshrl.u32 %v150_v50, 16  ;;  %v70_v17 = vld [vmem:[#allocation3 + $0xb0] sm:$0xff]  ;;  %v4212_v46 = vld [vmem:[#allocation6 + $0x458] sm:$0xff]  }
  0x8f   :  { %v309_v13 = vxor.u32 %v277_v7, %v4486_v52  ;;  %v341_v15 = vxor.u32 %v277_v7, %v4490_v4  ;;  %v4224_v0 = vld [vmem:[#allocation6 + $0x470] sm:$0xff]  }
  0x90   :  { %3868 = vmatpush3.bf16.msra.mxu0 %v4174_v18  ;;  %v371_v61 = vmul.u32 3266489909, %v307_v54  ;;  %v246_v1 = vxor.u32 %v3430_v57, %v150_v50  ;;  %v403_v5 = vmul.u32 3266489909, %v339_v55  ;;  %v4216_v50 = vld [vmem:[#allocation6 + $0x460] sm:$0xff]   ;;  %v4226_v7 = vld [vmem:[#allocation6 + $0x430] sm:$0xff]  }
  0x91   :  { %3869 = vmatprep.subr.bf16.mxu0 %v4176_v21  ;;  %3890 = vmatpush3.bf16.msra.mxu1 %v4175_v20  ;;  %v372_v18 = vmul.u32 3266489909, %v308_v10  ;;  %v55_v21 = vld [vmem:[#allocation3 + $0x38] sm:$0xff]  ;;  %v4218_v55 = vld [vmem:[#allocation6 + $0x420] sm:$0xff]  }
  0x92   :  { %3891 = vmatprep.subr.bf16.mxu1 %v4177_v22  ;;  %vm4552_vm4 = vcmp.ge.s32.totalorder %v371_v61, 0  ;;  %v278_v8 = vmul.u32 2246822507, %v246_v1  ;;  %vm4562_vm5 = vcmp.ge.s32.totalorder %v403_v5, 0  ;;  %v373_v22 = vmul.u32 3266489909, %v309_v13 }
  0x93   :  { %vm436_vm6 = vcmp.ge.s32.totalorder %v372_v18, 0  ;;  %vm509_vm11 = vmpackc.low %vm468_vm7, %vm4562_vm5  ;;  %v4219_v57 = vld [vmem:[#allocation6 + $0x4a0] sm:$0xff]   ;;  %v106_v61 = vadd.s32 2304, %v4458_v2  ;;  %v4223_v1 = vld [vmem:[#allocation6 + $0x4a8] sm:$0xff]  }
  0x94   :  { %3870 = vmatpush3.bf16.msra.mxu0 %v4178_v24  ;;  %v310_v14 = vxor.u32 %v278_v8, %v4486_v52  ;;  %v342_v16 = vxor.u32 %v278_v8, %v4490_v4  ;;  %v71_v24 = vld [vmem:[#allocation3 + $0xb8] sm:$0xff]  ;;  %vm493_vm8 = vmpackc.low %vm436_vm6, %vm4552_vm4  ;;  %vm437_vm9 = vcmp.ge.s32.totalorder %v373_v22, 0  ;;  %v4227_v8 = vld [vmem:[#allocation6 + $0x4b0] sm:$0xff]  }
  0x95   :  { %3871 = vmatprep.subr.bf16.mxu0 %v4180_v25  ;;  %3892 = vmatpush3.bf16.msra.mxu1 %v4179_v26  ;;  %v405_v25 = vmul.u32 3266489909, %v341_v15  ;;  %v4230_v18 = vld [vmem:[#allocation6 + $0x438] sm:$0xff]  }
  0x96   :  { %3893 = vmatprep.subr.bf16.mxu1 %v4181_v27  ;;  %v374_v23 = vmul.u32 3266489909, %v310_v14  ;;  %v406_v26 = vmul.u32 3266489909, %v342_v16  ;;  %v525_v27 = vsel %vm493_vm8, %v54_v12, 0  ;;  %v4231_v22 = vld [vmem:[#allocation6 + $0x4b8] sm:$0xff]  }
  0x97   :  { %vm469_vm12 = vcmp.ge.s32.totalorder %v405_v25, 0 }
  0x98   :  { %3872 = vmatpush3.bf16.msra.mxu0 %v4182_v28  ;;  %vm438_vm10 = vcmp.ge.s32.totalorder %v374_v23, 0  ;;  %vm470_vm13 = vcmp.ge.s32.totalorder %v406_v26, 0  ;;  %v4202_v28 = vld [vmem:[#allocation6 + $0x400] sm:$0xff]  }
  0x99   :  { %3873 = vmatprep.subr.bf16.mxu0 %v4184_v29  ;;  %3894 = vmatpush3.bf16.msra.mxu1 %v4183_v30  ;;  %v541_v29 = vsel %vm509_vm11, %v70_v17, 0  ;;  %vm494_vm14 = vmpackc.low %vm438_vm10, %vm437_vm9  ;;  %v4229_v17 = vld [vmem:[#allocation6 + $0x4f8] sm:$0xff]  }
  0x9a   :  { %3895 = vmatprep.subr.bf16.mxu1 %v4185_v31  ;;  %v3460_v30 = vcombine.low %v525_v27, %v541_v29  ;;  %v3461_v31 = vcombine.high %v525_v27, %v541_v29  ;;  %vm510_vm15 = vmpackc.low %vm470_vm13, %vm469_vm12  ;;  %v526_v32 = vsel %vm494_vm14, %v55_v21, 0  ;;  %v4232_v21 = vld [vmem:[#allocation6 + $0x540] sm:$0xff]  }
  0x9c   :  { %3874 = vmatpush3.bf16.msra.mxu0 %v4186_v33  ;;  %v4203_v33 = vld [vmem:[#allocation6 + $0x480] sm:$0xff]   ;;  %3015 = vmatprep.mubr.bf16.mxu0 %v3461_v31 }
  0x9d   :  { %3875 = vmatprep.subr.bf16.mxu0 %v4188_v34  ;;  %3896 = vmatpush3.bf16.msra.mxu1 %v4187_v35  ;;  %v542_v34 = vsel %vm510_vm15, %v71_v24, 0  ;;  %v4204_v35 = vld [vmem:[#allocation6 + $0x448] sm:$0xff]  }
  0x9e   :  { %3897 = vmatprep.subr.bf16.mxu1 %v4189_v37  ;;  %v3462_v36 = vcombine.low %v526_v32, %v542_v34  ;;  %v3463_v37 = vcombine.high %v526_v32, %v542_v34 }
  0xa0   :  { %3876 = vmatpush3.bf16.msra.mxu0 %v4190_v40  ;;  %v104_v40 = vadd.s32 2048, %v4458_v2  ;;  %3056 = vmatprep.mubr.bf16.mxu1 %v3463_v37 }
  0xa1   :  { %3877 = vmatprep.subr.bf16.mxu0 %v4192_v42  ;;  %3898 = vmatpush3.bf16.msra.mxu1 %v4191_v43  ;;  %v4208_v42 = vld [vmem:[#allocation6 + $0x450] sm:$0xff]  }
  0xa2   :  { %3899 = vmatprep.subr.bf16.mxu1 %v4193_v44  ;;  %v4209_v43 = vld [vmem:[#allocation6 + $0x4d0] sm:$0xff]   ;;  %v151_v44 = vmul.u32 2654435769, %v104_v40 }
  0xa4   :  { %3878 = vmatpush3.bf16.msra.mxu0 %v4194_v47  ;;  %v4211_v47 = vld [vmem:[#allocation6 + $0x490] sm:$0xff]   ;;  %v3431_v54 = vshrl.u32 %v151_v44, 16 }
  0xa5   :  { %3879 = vmatprep.subr.bf16.mxu0 %v4196_v51  ;;  %3900 = vmatpush3.bf16.msra.mxu1 %v4195_v48  ;;  %v4213_v48 = vld [vmem:[#allocation6 + $0x4d8] sm:$0xff]  }
  0xa6   :  { %3901 = vmatprep.subr.bf16.mxu1 %v4197_v58  ;;  %v4215_v51 = vld [vmem:[#allocation6 + $0x498] sm:$0xff]   ;;  %v105_v58 = vadd.s32 2176, %v4458_v2  ;;  %v247_v60 = vxor.u32 %v3431_v54, %v151_v44 }
  0xa8   :  { %3880 = vmatpush3.bf16.msra.mxu0 %v4198_v59  ;;  %v4221_v59 = vld [vmem:[#allocation6 + $0x4e8] sm:$0xff]   ;;  %v152_v5 = vmul.u32 2654435769, %v105_v58  ;;  %v279_v6 = vmul.u32 2246822507, %v247_v60 }
  0xa9   :  { %3909 = vmatprep.subr.bf16.mxu0 %v4200_v62  ;;  %3902 = vmatpush3.bf16.msra.mxu1 %v4199_v63  ;;  %v4222_v62 = vld [vmem:[#allocation6 + $0x428] sm:$0xff]   ;;  %v107_v63 = vadd.s32 2432, %v4458_v2 }
  0xaa   :  { %3931 = vmatprep.subr.bf16.mxu1 %v4201_v9  ;;  %v153_v9 = vmul.u32 2654435769, %v106_v61  ;;  %v3432_v12 = vshrl.u32 %v152_v5, 16  ;;  %v311_v13 = vxor.u32 %v279_v6, %v4486_v52  ;;  %v343_v14 = vxor.u32 %v279_v6, %v4490_v4  ;;  %v4237_v60 = vld [vmem:[#allocation6 + $0x5c8] sm:$0xff]   ;;  %v4244_v6 = vld [vmem:[#allocation6 + $0x558] sm:$0xff]  }
  0xab   :  { %3016 = vmatmul.mubr.bf16.vlgmr.msra.gmra.mrb[12].mxu0 %v3460_v30  ;;  %v154_v10 = vmul.u32 2654435769, %v107_v63  ;;  %v4233_v30 = vld [vmem:[#allocation6 + $0x5c0] sm:$0xff]   ;;  %v4238_v61 = vld [vmem:[#allocation6 + $0x508] sm:$0xff]  }
  0xac   :  { %3910 = vmatpush3.bf16.msra.mxu0 %v4202_v28  ;;  %3057 = vmatmul.mubr.bf16.vlgmr.msra.gmra.mrb[12].mxu1 %v3462_v36  ;;  %v3433_v15 = vshrl.u32 %v153_v9, 16  ;;  %v248_v19 = vxor.u32 %v3432_v12, %v152_v5  ;;  %v375_v20 = vmul.u32 3266489909, %v311_v13  ;;  %v407_v26 = vmul.u32 3266489909, %v343_v14  ;;  %v4239_v63 = vld [vmem:[#allocation6 + $0x588] sm:$0xff]  }
  0xad   :  { %3911 = vmatprep.subr.bf16.mxu0 %v4204_v35  ;;  %3932 = vmatpush3.bf16.msra.mxu1 %v4203_v33  ;;  %v3434_v16 = vshrl.u32 %v154_v10, 16  ;;  %v56_v33 = vld [vmem:[#allocation3 + $0x40] sm:$0xff]  ;;  %v4242_v5 = vld [vmem:[#allocation6 + $0x510] sm:$0xff]  }
  0xae   :  { %3933 = vmatprep.subr.bf16.mxu1 %v4205_v38  ;;  %v249_v23 = vxor.u32 %v3433_v15, %v153_v9  ;;  %v280_v25 = vmul.u32 2246822507, %v248_v19  ;;  %vm4576_vm0 = vcmp.ge.s32.totalorder %v375_v20, 0  ;;  %v72_v38 = vld [vmem:[#allocation3 + $0xc0] sm:$0xff]  ;;  %vm4586_vm1 = vcmp.ge.s32.totalorder %v407_v26, 0  ;;  %v4246_v9 = vld [vmem:[#allocation6 + $0x518] sm:$0xff]  }
  0xaf   :  { %v250_v24 = vxor.u32 %v3434_v16, %v154_v10  ;;  %v4248_v10 = vld [vmem:[#allocation6 + $0x560] sm:$0xff]   ;;  %v4252_v15 = vld [vmem:[#allocation6 + $0x568] sm:$0xff]   ;;  %v110_v20 = vadd.s32 2816, %v4458_v2 }
  0xb0   :  { %3912 = vmatpush3.bf16.msra.mxu0 %v4206_v39  ;;  %v281_v28 = vmul.u32 2246822507, %v249_v23  ;;  %v312_v31 = vxor.u32 %v280_v25, %v4486_v52  ;;  %v344_v32 = vxor.u32 %v280_v25, %v4490_v4  ;;  %v4249_v12 = vld [vmem:[#allocation6 + $0x5e0] sm:$0xff]   ;;  %v4256_v23 = vld [vmem:[#allocation6 + $0x570] sm:$0xff]  }
  0xb1   :  { %3913 = vmatprep.subr.bf16.mxu0 %v4208_v42  ;;  %3934 = vmatpush3.bf16.msra.mxu1 %v4207_v41  ;;  %v282_v29 = vmul.u32 2246822507, %v250_v24  ;;  %v57_v42 = vld [vmem:[#allocation3 + $0x48] sm:$0xff]  ;;  %v4250_v14 = vld [vmem:[#allocation6 + $0x520] sm:$0xff]   ;;  %v4257_v25 = vld [vmem:[#allocation6 + $0x5f0] sm:$0xff]  }
  0xb2   :  { %3935 = vmatprep.subr.bf16.mxu1 %v4209_v43  ;;  %v313_v34 = vxor.u32 %v281_v28, %v4486_v52  ;;  %v345_v36 = vxor.u32 %v281_v28, %v4490_v4  ;;  %v376_v39 = vmul.u32 3266489909, %v312_v31  ;;  %v408_v40 = vmul.u32 3266489909, %v344_v32  ;;  %v4251_v16 = vld [vmem:[#allocation6 + $0x5a0] sm:$0xff]   ;;  %v4255_v24 = vld [vmem:[#allocation6 + $0x5a8] sm:$0xff]  }
  0xb3   :  { %v314_v35 = vxor.u32 %v282_v29, %v4486_v52  ;;  %v346_v37 = vxor.u32 %v282_v29, %v4490_v4  ;;  %v4258_v28 = vld [vmem:[#allocation6 + $0x530] sm:$0xff]   ;;  %v4260_v32 = vld [vmem:[#allocation6 + $0x578] sm:$0xff]  }
  0xb4   :  { %3914 = vmatpush3.bf16.msra.mxu0 %v4210_v45  ;;  %v377_v43 = vmul.u32 3266489909, %v313_v34  ;;  %vm440_vm2 = vcmp.ge.s32.totalorder %v376_v39, 0  ;;  %vm472_vm3 = vcmp.ge.s32.totalorder %v408_v40, 0  ;;  %v73_v45 = vld [vmem:[#allocation3 + $0xc8] sm:$0xff]  ;;  %v4259_v29 = vld [vmem:[#allocation6 + $0x5b0] sm:$0xff]  }
  0xb5   :  { %3915 = vmatprep.subr.bf16.mxu0 %v4212_v46  ;;  %3936 = vmatpush3.bf16.msra.mxu1 %v4211_v47  ;;  %v378_v44 = vmul.u32 3266489909, %v314_v35  ;;  %v409_v46 = vmul.u32 3266489909, %v345_v36  ;;  %vm495_vm4 = vmpackc.low %vm440_vm2, %vm4576_vm0  ;;  %v4262_v39 = vld [vmem:[#allocation6 + $0x538] sm:$0xff]  }
  0xb6   :  { %3937 = vmatprep.subr.bf16.mxu1 %v4213_v48  ;;  %v410_v47 = vmul.u32 3266489909, %v346_v37  ;;  %vm441_vm5 = vcmp.ge.s32.totalorder %v377_v43, 0  ;;  %vm511_vm7 = vmpackc.low %vm472_vm3, %vm4586_vm1  ;;  %v527_v48 = vsel %vm495_vm4, %v56_v33, 0  ;;  %v4263_v43 = vld [vmem:[#allocation6 + $0x5b8] sm:$0xff]  }
  0xb7   :  { %vm442_vm6 = vcmp.ge.s32.totalorder %v378_v44, 0  ;;  %vm473_vm8 = vcmp.ge.s32.totalorder %v409_v46, 0 }
  0xb8   :  { %3916 = vmatpush3.bf16.msra.mxu0 %v4214_v49  ;;  %vm474_vm9 = vcmp.ge.s32.totalorder %v410_v47, 0  ;;  %v4234_v49 = vld [vmem:[#allocation6 + $0x500] sm:$0xff]   ;;  %vm496_vm10 = vmpackc.low %vm442_vm6, %vm441_vm5 }
  0xb9   :  { %3917 = vmatprep.subr.bf16.mxu0 %v4216_v50  ;;  %3938 = vmatpush3.bf16.msra.mxu1 %v4215_v51  ;;  %v543_v50 = vsel %vm511_vm7, %v72_v38, 0  ;;  %vm512_vm11 = vmpackc.low %vm474_vm9, %vm473_vm8  ;;  %v528_v54 = vsel %vm496_vm10, %v57_v42, 0  ;;  %v4261_v38 = vld [vmem:[#allocation6 + $0x5f8] sm:$0xff]   ;;  %v4264_v42 = vld [vmem:[#allocation6 + $0x640] sm:$0xff]  }
  0xba   :  { %3939 = vmatprep.subr.bf16.mxu1 %v4217_v53  ;;  %v3464_v51 = vcombine.low %v527_v48, %v543_v50  ;;  %v3465_v53 = vcombine.high %v527_v48, %v543_v50 }
  0xbc   :  { %3918 = vmatpush3.bf16.msra.mxu0 %v4218_v55  ;;  %v4235_v55 = vld [vmem:[#allocation6 + $0x580] sm:$0xff]   ;;  %3097 = vmatprep.mubr.bf16.mxu0 %v3465_v53 }
  0xbd   :  { %3919 = vmatprep.subr.bf16.mxu0 %v4220_v56  ;;  %3940 = vmatpush3.bf16.msra.mxu1 %v4219_v57  ;;  %v544_v56 = vsel %vm512_vm11, %v73_v45, 0  ;;  %v4236_v57 = vld [vmem:[#allocation6 + $0x548] sm:$0xff]  }
  0xbe   :  { %3941 = vmatprep.subr.bf16.mxu1 %v4221_v59  ;;  %v3466_v58 = vcombine.low %v528_v54, %v544_v56  ;;  %v3467_v59 = vcombine.high %v528_v54, %v544_v56 }
  0xc0   :  { %3920 = vmatpush3.bf16.msra.mxu0 %v4222_v62  ;;  %v108_v62 = vadd.s32 2560, %v4458_v2  ;;  %3138 = vmatprep.mubr.bf16.mxu1 %v3467_v59 }
  0xc1   :  { %3921 = vmatprep.subr.bf16.mxu0 %v4224_v0  ;;  %3942 = vmatpush3.bf16.msra.mxu1 %v4223_v1  ;;  %v4240_v0 = vld [vmem:[#allocation6 + $0x550] sm:$0xff]  }
  0xc2   :  { %3943 = vmatprep.subr.bf16.mxu1 %v4225_v3  ;;  %v4241_v1 = vld [vmem:[#allocation6 + $0x5d0] sm:$0xff]   ;;  %v155_v3 = vmul.u32 2654435769, %v108_v62 }
  0xc4   :  { %3922 = vmatpush3.bf16.msra.mxu0 %v4226_v7  ;;  %v4243_v7 = vld [vmem:[#allocation6 + $0x590] sm:$0xff]   ;;  %v3435_v13 = vshrl.u32 %v155_v3, 16 }
  0xc5   :  { %3923 = vmatprep.subr.bf16.mxu0 %v4228_v11  ;;  %3944 = vmatpush3.bf16.msra.mxu1 %v4227_v8  ;;  %v4245_v8 = vld [vmem:[#allocation6 + $0x5d8] sm:$0xff]  }
  0xc6   :  { %3945 = vmatprep.subr.bf16.mxu1 %v4229_v17  ;;  %v4247_v11 = vld [vmem:[#allocation6 + $0x598] sm:$0xff]   ;;  %v109_v17 = vadd.s32 2688, %v4458_v2  ;;  %v251_v19 = vxor.u32 %v3435_v13, %v155_v3 }
  0xc8   :  { %3924 = vmatpush3.bf16.msra.mxu0 %v4230_v18  ;;  %v4253_v18 = vld [vmem:[#allocation6 + $0x5e8] sm:$0xff]   ;;  %v156_v26 = vmul.u32 2654435769, %v109_v17  ;;  %v283_v27 = vmul.u32 2246822507, %v251_v19 }
  0xc9   :  { %3953 = vmatprep.subr.bf16.mxu0 %v4232_v21  ;;  %3946 = vmatpush3.bf16.msra.mxu1 %v4231_v22  ;;  %v4254_v21 = vld [vmem:[#allocation6 + $0x528] sm:$0xff]   ;;  %v111_v22 = vadd.s32 2944, %v4458_v2 }
  0xca   :  { %3975 = vmatprep.subr.bf16.mxu1 %v4233_v30  ;;  %v157_v30 = vmul.u32 2654435769, %v110_v20  ;;  %v3436_v33 = vshrl.u32 %v156_v26, 16  ;;  %v315_v34 = vxor.u32 %v283_v27, %v4486_v52  ;;  %v347_v35 = vxor.u32 %v283_v27, %v4490_v4  ;;  %v4269_v19 = vld [vmem:[#allocation6 + $0x6c8] sm:$0xff]   ;;  %v4276_v27 = vld [vmem:[#allocation6 + $0x658] sm:$0xff]  }
  0xcb   :  { %3098 = vmatmul.mubr.bf16.vlgmr.msra.gmra.mrb[16].mxu0 %v3464_v51  ;;  %v158_v31 = vmul.u32 2654435769, %v111_v22  ;;  %v4265_v51 = vld [vmem:[#allocation6 + $0x6c0] sm:$0xff]   ;;  %v4270_v20 = vld [vmem:[#allocation6 + $0x608] sm:$0xff]  }
  0xcc   :  { %3954 = vmatpush3.bf16.msra.mxu0 %v4234_v49  ;;  %3139 = vmatmul.mubr.bf16.vlgmr.msra.gmra.mrb[16].mxu1 %v3466_v58  ;;  %v3437_v36 = vshrl.u32 %v157_v30, 16  ;;  %v252_v40 = vxor.u32 %v3436_v33, %v156_v26  ;;  %v379_v41 = vmul.u32 3266489909, %v315_v34  ;;  %v411_v47 = vmul.u32 3266489909, %v347_v35  ;;  %v4271_v22 = vld [vmem:[#allocation6 + $0x688] sm:$0xff]  }
  0xcd   :  { %3955 = vmatprep.subr.bf16.mxu0 %v4236_v57  ;;  %3976 = vmatpush3.bf16.msra.mxu1 %v4235_v55  ;;  %v3438_v37 = vshrl.u32 %v158_v31, 16  ;;  %v58_v55 = vld [vmem:[#allocation3 + $0x50] sm:$0xff]  ;;  %v4279_v33 = vld [vmem:[#allocation6 + $0x698] sm:$0xff]   ;;  %v114_v34 = vadd.s32 3328, %v4458_v2  ;;  %v4281_v35 = vld [vmem:[#allocation6 + $0x6e0] sm:$0xff]  }
  0xce   :  { %3977 = vmatprep.subr.bf16.mxu1 %v4237_v60  ;;  %v253_v44 = vxor.u32 %v3437_v36, %v157_v30  ;;  %v284_v46 = vmul.u32 2246822507, %v252_v40  ;;  %vm4600_vm12 = vcmp.ge.s32.totalorder %v379_v41, 0  ;;  %v74_v60 = vld [vmem:[#allocation3 + $0xd0] sm:$0xff]  ;;  %vm4610_vm13 = vcmp.ge.s32.totalorder %v411_v47, 0  ;;  %v4278_v30 = vld [vmem:[#allocation6 + $0x618] sm:$0xff]  }
  0xcf   :  { %v254_v45 = vxor.u32 %v3438_v37, %v158_v31  ;;  %v4274_v26 = vld [vmem:[#allocation6 + $0x610] sm:$0xff]   ;;  %v4280_v31 = vld [vmem:[#allocation6 + $0x660] sm:$0xff]   ;;  %v4286_v47 = vld [vmem:[#allocation6 + $0x628] sm:$0xff]  }
  0xd0   :  { %3956 = vmatpush3.bf16.msra.mxu0 %v4238_v61  ;;  %v285_v49 = vmul.u32 2246822507, %v253_v44  ;;  %v316_v53 = vxor.u32 %v284_v46, %v4486_v52  ;;  %v348_v54 = vxor.u32 %v284_v46, %v4490_v4  ;;  %v4282_v37 = vld [vmem:[#allocation6 + $0x620] sm:$0xff]  }
  0xd1   :  { %3957 = vmatprep.subr.bf16.mxu0 %v4240_v0  ;;  %3978 = vmatpush3.bf16.msra.mxu1 %v4239_v63  ;;  %v286_v50 = vmul.u32 2246822507, %v254_v45  ;;  %v59_v0 = vld [vmem:[#allocation3 + $0x58] sm:$0xff]  ;;  %v4283_v41 = vld [vmem:[#allocation6 + $0x6a0] sm:$0xff]  }
  0xd2   :  { %3979 = vmatprep.subr.bf16.mxu1 %v4241_v1  ;;  %v317_v56 = vxor.u32 %v285_v49, %v4486_v52  ;;  %v349_v58 = vxor.u32 %v285_v49, %v4490_v4  ;;  %v380_v61 = vmul.u32 3266489909, %v316_v53  ;;  %v412_v62 = vmul.u32 3266489909, %v348_v54  ;;  %v4288_v49 = vld [vmem:[#allocation6 + $0x670] sm:$0xff]  }
  0xd3   :  { %v318_v57 = vxor.u32 %v286_v50, %v4486_v52  ;;  %v350_v59 = vxor.u32 %v286_v50, %v4490_v4 }
  0xd4   :  { %3958 = vmatpush3.bf16.msra.mxu0 %v4242_v5  ;;  %v381_v1 = vmul.u32 3266489909, %v317_v56  ;;  %vm444_vm14 = vcmp.ge.s32.totalorder %v380_v61, 0  ;;  %vm476_vm15 = vcmp.ge.s32.totalorder %v412_v62, 0  ;;  %v75_v5 = vld [vmem:[#allocation3 + $0xd8] sm:$0xff] }
  0xd5   :  { %3959 = vmatprep.subr.bf16.mxu0 %v4244_v6  ;;  %3980 = vmatpush3.bf16.msra.mxu1 %v4243_v7  ;;  %v382_v3 = vmul.u32 3266489909, %v318_v57  ;;  %v413_v6 = vmul.u32 3266489909, %v349_v58  ;;  %vm497_vm0 = vmpackc.low %vm444_vm14, %vm4600_vm12  ;;  %v4290_v58 = vld [vmem:[#allocation6 + $0x630] sm:$0xff]   ;;  %v4292_v62 = vld [vmem:[#allocation6 + $0x678] sm:$0xff]  }
  0xd6   :  { %3981 = vmatprep.subr.bf16.mxu1 %v4245_v8  ;;  %v414_v7 = vmul.u32 3266489909, %v350_v59  ;;  %vm445_vm1 = vcmp.ge.s32.totalorder %v381_v1, 0  ;;  %vm513_vm3 = vmpackc.low %vm476_vm15, %vm4610_vm13  ;;  %v529_v8 = vsel %vm497_vm0, %v58_v55, 0  ;;  %v4289_v55 = vld [vmem:[#allocation6 + $0x6f0] sm:$0xff]  }
  0xd7   :  { %vm446_vm2 = vcmp.ge.s32.totalorder %v382_v3, 0  ;;  %vm477_vm4 = vcmp.ge.s32.totalorder %v413_v6, 0  ;;  %v4291_v59 = vld [vmem:[#allocation6 + $0x6b0] sm:$0xff]   ;;  %v4293_v6 = vld [vmem:[#allocation6 + $0x6f8] sm:$0xff]  }
  0xd8   :  { %3960 = vmatpush3.bf16.msra.mxu0 %v4246_v9  ;;  %vm478_vm5 = vcmp.ge.s32.totalorder %v414_v7, 0  ;;  %v4266_v9 = vld [vmem:[#allocation6 + $0x600] sm:$0xff]   ;;  %vm498_vm6 = vmpackc.low %vm446_vm2, %vm445_vm1  ;;  %v4294_v7 = vld [vmem:[#allocation6 + $0x638] sm:$0xff]  }
  0xd9   :  { %3961 = vmatprep.subr.bf16.mxu0 %v4248_v10  ;;  %3982 = vmatpush3.bf16.msra.mxu1 %v4247_v11  ;;  %v545_v10 = vsel %vm513_vm3, %v74_v60, 0  ;;  %vm514_vm7 = vmpackc.low %vm478_vm5, %vm477_vm4  ;;  %v530_v13 = vsel %vm498_vm6, %v59_v0, 0  ;;  %v161_v60 = vmul.u32 2654435769, %v114_v34 }
  0xda   :  { %3983 = vmatprep.subr.bf16.mxu1 %v4249_v12  ;;  %v3468_v11 = vcombine.low %v529_v8, %v545_v10  ;;  %v3469_v12 = vcombine.high %v529_v8, %v545_v10  ;;  %v4296_v10 = vld [vmem:[#allocation6 + $0x740] sm:$0xff]  }
  0xdb   :  { %v3441_v3 = vshrl.u32 %v161_v60, 16 }
  0xdc   :  { %3962 = vmatpush3.bf16.msra.mxu0 %v4250_v14  ;;  %v4267_v14 = vld [vmem:[#allocation6 + $0x680] sm:$0xff]   ;;  %3179 = vmatprep.mubr.bf16.mxu0 %v3469_v12 }
  0xdd   :  { %3963 = vmatprep.subr.bf16.mxu0 %v4252_v15  ;;  %3984 = vmatpush3.bf16.msra.mxu1 %v4251_v16  ;;  %v546_v15 = vsel %vm514_vm7, %v75_v5, 0  ;;  %v4268_v16 = vld [vmem:[#allocation6 + $0x648] sm:$0xff]  }
  0xde   :  { %3985 = vmatprep.subr.bf16.mxu1 %v4253_v18  ;;  %v3470_v17 = vcombine.low %v530_v13, %v546_v15  ;;  %v3471_v18 = vcombine.high %v530_v13, %v546_v15  ;;  %v4295_v15 = vld [vmem:[#allocation6 + $0x6b8] sm:$0xff]  }
  0xe0   :  { %3964 = vmatpush3.bf16.msra.mxu0 %v4254_v21  ;;  %v112_v21 = vadd.s32 3072, %v4458_v2  ;;  %3220 = vmatprep.mubr.bf16.mxu1 %v3471_v18 }
  0xe1   :  { %3965 = vmatprep.subr.bf16.mxu0 %v4256_v23  ;;  %3986 = vmatpush3.bf16.msra.mxu1 %v4255_v24  ;;  %v4272_v23 = vld [vmem:[#allocation6 + $0x650] sm:$0xff]  }
  0xe2   :  { %3987 = vmatprep.subr.bf16.mxu1 %v4257_v25  ;;  %v4273_v24 = vld [vmem:[#allocation6 + $0x6d0] sm:$0xff]   ;;  %v159_v25 = vmul.u32 2654435769, %v112_v21  ;;  %v60_v21 = vld [vmem:[#allocation3 + $0x60] sm:$0xff] }
  0xe4   :  { %3966 = vmatpush3.bf16.msra.mxu0 %v4258_v28  ;;  %v4275_v28 = vld [vmem:[#allocation6 + $0x690] sm:$0xff]   ;;  %v3439_v36 = vshrl.u32 %v159_v25, 16 }
  0xe5   :  { %3967 = vmatprep.subr.bf16.mxu0 %v4260_v32  ;;  %3988 = vmatpush3.bf16.msra.mxu1 %v4259_v29  ;;  %v4277_v29 = vld [vmem:[#allocation6 + $0x6d8] sm:$0xff]   ;;  %v113_v32 = vadd.s32 3200, %v4458_v2 }
  0xe6   :  { %3989 = vmatprep.subr.bf16.mxu1 %v4261_v38  ;;  %v115_v38 = vadd.s32 3456, %v4458_v2  ;;  %v255_v44 = vxor.u32 %v3439_v36, %v159_v25 }
  0xe7   :  { %v160_v56 = vmul.u32 2654435769, %v113_v32  ;;  %v61_v32 = vld [vmem:[#allocation3 + $0x68] sm:$0xff] }
  0xe8   :  { %3968 = vmatpush3.bf16.msra.mxu0 %v4262_v39  ;;  %v4284_v39 = vld [vmem:[#allocation6 + $0x668] sm:$0xff]   ;;  %v287_v57 = vmul.u32 2246822507, %v255_v44  ;;  %v162_v61 = vmul.u32 2654435769, %v115_v38 }
  0xe9   :  { %3997 = vmatprep.subr.bf16.mxu0 %v4264_v42  ;;  %3990 = vmatpush3.bf16.msra.mxu1 %v4263_v43  ;;  %v4285_v43 = vld [vmem:[#allocation6 + $0x6e8] sm:$0xff]   ;;  %v3440_v63 = vshrl.u32 %v160_v56, 16 }
  0xea   :  { %4019 = vmatprep.subr.bf16.mxu1 %v4265_v51  ;;  %v4287_v51 = vld [vmem:[#allocation6 + $0x6a8] sm:$0xff]   ;;  %v319_v0 = vxor.u32 %v287_v57, %v4486_v52  ;;  %v351_v1 = vxor.u32 %v287_v57, %v4490_v4  ;;  %v3442_v5 = vshrl.u32 %v162_v61, 16 }
  0xeb   :  { %3180 = vmatmul.mubr.bf16.vlgmr.msra.gmra.mrb[20].mxu0 %v3468_v11  ;;  %v256_v8 = vxor.u32 %v3440_v63, %v160_v56  ;;  %v257_v11 = vxor.u32 %v3441_v3, %v161_v60  ;;  %v4300_v56 = vld [vmem:[#allocation6 + $0x708] sm:$0xff]   ;;  %v116_v3 = vadd.s32 3584, %v4458_v2 }
  0xec   :  { %3998 = vmatpush3.bf16.msra.mxu0 %v4266_v9  ;;  %3221 = vmatmul.mubr.bf16.vlgmr.msra.gmra.mrb[20].mxu1 %v3470_v17  ;;  %v383_v9 = vmul.u32 3266489909, %v319_v0  ;;  %v258_v12 = vxor.u32 %v3442_v5, %v162_v61  ;;  %v4301_v57 = vld [vmem:[#allocation6 + $0x788] sm:$0xff]   ;;  %v4303_v61 = vld [vmem:[#allocation6 + $0x710] sm:$0xff]   ;;  %v4306_v5 = vld [vmem:[#allocation6 + $0x718] sm:$0xff]  }
  0xed   :  { %3999 = vmatprep.subr.bf16.mxu0 %v4268_v16  ;;  %4020 = vmatpush3.bf16.msra.mxu1 %v4267_v14  ;;  %v288_v13 = vmul.u32 2246822507, %v256_v8  ;;  %v415_v14 = vmul.u32 3266489909, %v351_v1  ;;  %v4304_v1 = vld [vmem:[#allocation6 + $0x790] sm:$0xff]   ;;  %v4309_v8 = vld [vmem:[#allocation6 + $0x720] sm:$0xff]  }
  0xee   :  { %4021 = vmatprep.subr.bf16.mxu1 %v4269_v19  ;;  %vm4630_vm8 = vcmp.ge.s32.totalorder %v383_v9, 0  ;;  %v289_v17 = vmul.u32 2246822507, %v257_v11  ;;  %v290_v18 = vmul.u32 2246822507, %v258_v12  ;;  %v118_v9 = vadd.s32 3840, %v4458_v2 }
  0xef   :  { %v320_v19 = vxor.u32 %v288_v13, %v4486_v52  ;;  %vm4640_vm9 = vcmp.ge.s32.totalorder %v415_v14, 0  ;;  %v4311_v12 = vld [vmem:[#allocation6 + $0x768] sm:$0xff]   ;;  %v4310_v14 = vld [vmem:[#allocation6 + $0x7a0] sm:$0xff]  }
  0xf0   :  { %4000 = vmatpush3.bf16.msra.mxu0 %v4270_v20  ;;  %v352_v20 = vxor.u32 %v288_v13, %v4490_v4  ;;  %v354_v25 = vxor.u32 %v290_v18, %v4490_v4 }
  0xf1   :  { %4001 = vmatprep.subr.bf16.mxu0 %v4272_v23  ;;  %4022 = vmatpush3.bf16.msra.mxu1 %v4271_v22  ;;  %v321_v22 = vxor.u32 %v289_v17, %v4486_v52  ;;  %v322_v23 = vxor.u32 %v290_v18, %v4486_v52  ;;  %v4312_v18 = vld [vmem:[#allocation6 + $0x728] sm:$0xff]  }
  0xf2   :  { %4023 = vmatprep.subr.bf16.mxu1 %v4273_v24  ;;  %v353_v24 = vxor.u32 %v289_v17, %v4490_v4  ;;  %v418_v36 = vmul.u32 3266489909, %v354_v25 }
  0xf3   :  { %v386_v34 = vmul.u32 3266489909, %v322_v23 }
  0xf4   :  { %4002 = vmatpush3.bf16.msra.mxu0 %v4274_v26  ;;  %vm482_vm1 = vcmp.ge.s32.totalorder %v418_v36, 0 }
  0xf5   :  { %4003 = vmatprep.subr.bf16.mxu0 %v4276_v27  ;;  %4024 = vmatpush3.bf16.msra.mxu1 %v4275_v28  ;;  %v76_v27 = vld [vmem:[#allocation3 + $0xe0] sm:$0xff]  ;;  %v384_v28 = vmul.u32 3266489909, %v320_v19  ;;  %vm450_vm14 = vcmp.ge.s32.totalorder %v386_v34, 0  ;;  %v4314_v19 = vld [vmem:[#allocation6 + $0x770] sm:$0xff]  }
  0xf6   :  { %4025 = vmatprep.subr.bf16.mxu1 %v4277_v29  ;;  %v416_v29 = vmul.u32 3266489909, %v352_v20 }
  0xf7   :  { %vm448_vm10 = vcmp.ge.s32.totalorder %v384_v28, 0 }
  0xf8   :  { %4004 = vmatpush3.bf16.msra.mxu0 %v4278_v30  ;;  %vm480_vm11 = vcmp.ge.s32.totalorder %v416_v29, 0  ;;  %vm499_vm12 = vmpackc.low %vm448_vm10, %vm4630_vm8 }
  0xf9   :  { %4005 = vmatprep.subr.bf16.mxu0 %v4280_v31  ;;  %4026 = vmatpush3.bf16.msra.mxu1 %v4279_v33  ;;  %v385_v33 = vmul.u32 3266489909, %v321_v22  ;;  %vm515_vm15 = vmpackc.low %vm480_vm11, %vm4640_vm9  ;;  %v531_v38 = vsel %vm499_vm12, %v60_v21, 0  ;;  %v165_v21 = vmul.u32 2654435769, %v118_v9 }
  0xfa   :  { %4027 = vmatprep.subr.bf16.mxu1 %v4281_v35  ;;  %v417_v35 = vmul.u32 3266489909, %v353_v24 }
  0xfb   :  { %vm449_vm13 = vcmp.ge.s32.totalorder %v385_v33, 0  ;;  %v3445_v28 = vshrl.u32 %v165_v21, 16 }
  0xfc   :  { %4006 = vmatpush3.bf16.msra.mxu0 %v4282_v37  ;;  %v4402_v37 = vmov 0   ;;  %vm481_vm0 = vcmp.ge.s32.totalorder %v417_v35, 0  ;;  %vm500_vm2 = vmpackc.low %vm450_vm14, %vm449_vm13 }
  0xfd   :  { %4007 = vmatprep.subr.bf16.mxu0 %v4284_v39  ;;  %4028 = vmatpush3.bf16.msra.mxu1 %v4283_v41  ;;  %v77_v39 = vld [vmem:[#allocation3 + $0xe8] sm:$0xff]  ;;  %vm516_vm3 = vmpackc.low %vm482_vm1, %vm481_vm0  ;;  %v532_v44 = vsel %vm500_vm2, %v61_v32, 0  ;;  %vm2733_vm0 = vcmask 523264  }
  0xfe   :  { %4029 = vmatprep.subr.bf16.mxu1 %v4285_v43 }
 0x100   :  { %4008 = vmatpush3.bf16.msra.mxu0 %v4286_v47 }
 0x101   :  { %4009 = vmatprep.subr.bf16.mxu0 %v4288_v49  ;;  %4030 = vmatpush3.bf16.msra.mxu1 %v4287_v51  ;;  %v4299_v49 = vld [vmem:[#allocation6 + $0x748] sm:$0xff]  }
 0x102   :  { %4031 = vmatprep.subr.bf16.mxu1 %v4289_v55  ;;  %v4298_v55 = vld [vmem:[#allocation6 + $0x780] sm:$0xff]  }
 0x104   :  { %4010 = vmatpush3.bf16.msra.mxu0 %v4290_v58  ;;  %v4302_v58 = vld [vmem:[#allocation6 + $0x750] sm:$0xff]  }
 0x105   :  { %4011 = vmatprep.subr.bf16.mxu0 %v4292_v62  ;;  %4032 = vmatpush3.bf16.msra.mxu1 %v4291_v59  ;;  %v3447_v59 = vld [vmem:[%s4713_s3] ss:$0 sm:$0xff]  ;;  %v4305_v62 = vld [vmem:[#allocation6 + $0x758] sm:$0xff]  }
 0x106   :  { %4033 = vmatprep.subr.bf16.mxu1 %v4293_v6  ;;  %v117_v6 = vadd.s32 3712, %v4458_v2 }
 0x108   :  { %4012 = vmatpush3.bf16.msra.mxu0 %v4294_v7  ;;  %v4307_v7 = vld [vmem:[#allocation6 + $0x798] sm:$0xff]   ;;  %v164_v11 = vmul.u32 2654435769, %v117_v6 }
 0x109   :  { %4041 = vmatprep.subr.bf16.mxu0 %v4296_v10  ;;  %4034 = vmatpush3.bf16.msra.mxu1 %v4295_v15  ;;  %v119_v10 = vadd.s32 3968, %v4458_v2 }
 0x10a   :  { %3352 = vmatprep.subr.bf16.mxu1 %v4402_v37  ;;  %v3444_v15 = vshrl.u32 %v164_v11, 16 }
 0x10b   :  { %v166_v23 = vmul.u32 2654435769, %v119_v10 }
 0x10c   :  { %v260_v20 = vxor.u32 %v3444_v15, %v164_v11  ;;  %v79_v15 = vld [vmem:[#allocation3 + $0xf8] sm:$0xff] }
 0x10d   :  { %v3446_v35 = vshrl.u32 %v166_v23, 16 }
 0x11e   :  { %v3749_v40 = vpop.f32.mrb[0].mxu0 }
 0x11f   :  { %v3750_v42 = vpop.f32.mrb[1].mxu0  ;;  %v3771_v48 = vpop.f32.mrb[0].mxu1 }
 0x120   :  { %v4622_v45 = vadd.f32 %v3750_v42, %v3749_v40  ;;  %v3752_v46 = vpop.f32.mrb[2].mxu0  ;;  %v3772_v50 = vpop.f32.mrb[1].mxu1  ;;  %v547_v40 = vsel %vm515_vm15, %v76_v27, 0  ;;  %v292_v27 = vmul.u32 2246822507, %v260_v20  ;;  %v4322_v20 = vld [vmem:[#allocation6 + $0x7d0] sm:$0xff]  }
 0x121   :  { %v4624_v53 = vadd.f32 %v3772_v50, %v3771_v48  ;;  %v4626_v54 = vpop.f32.mrb[2].mxu1  ;;  %v3753_v26 = vpop.f32.mrb[3].mxu0  ;;  %v3472_v42 = vcombine.low %v531_v38, %v547_v40  ;;  %v3473_v43 = vcombine.high %v531_v38, %v547_v40  ;;  %v548_v48 = vsel %vm516_vm3, %v77_v39, 0  ;;  %v4315_v39 = vld [vmem:[#allocation6 + $0x730] sm:$0xff]  }
 0x122   :  { %v3754_v30 = vadd.f32 %v3753_v26, %v3752_v46  ;;  %v3775_v41 = vpop.f32.mrb[3].mxu1  ;;  %v4297_v46 = vld [vmem:[#allocation6 + $0x700] sm:$0xff]   ;;  %v3474_v50 = vcombine.low %v532_v44, %v548_v48  ;;  %v3475_v51 = vcombine.high %v532_v44, %v548_v48  ;;  %v4313_v26 = vld [vmem:[#allocation6 + $0x7a8] sm:$0xff]   ;;  %v324_v40 = vxor.u32 %v292_v27, %v4486_v52  ;;  %v4317_v44 = vld [vmem:[#allocation6 + $0x778] sm:$0xff]  }
 0x123   :  { %v3776_v47 = vadd.f32 %v3775_v41, %v4626_v54  ;;  %3261 = vmatprep.mubr.bf16.mxu0 %v3473_v43  ;;  %v2772_v54 = vadd.f32 %v4622_v45, %v3447_v59  ;;  %v4308_v45 = vld [vmem:[#allocation6 + $0x760] sm:$0xff]   ;;  %v356_v41 = vxor.u32 %v292_v27, %v4490_v4  ;;  %v262_v48 = vxor.u32 %v3446_v35, %v166_v23 }
 0x124   :  { %3262 = vmatmul.mubr.bf16.vlgmr.msra.gmra.mrb[24].mxu0 %v3472_v42  ;;  %3302 = vmatprep.mubr.bf16.mxu1 %v3475_v51  ;;  %v2775_v60 = vadd.f32 %v3754_v30, %v3447_v59  ;;  %v261_v42 = vxor.u32 %v3445_v28, %v165_v21  ;;  %v62_v51 = vld [vmem:[#allocation3 + $0x70] sm:$0xff]  ;;  %v4323_v21 = vld [vmem:[#allocation6 + $0x7d8] sm:$0xff]  }
 0x125   :  { %4042 = vmatpush3.bf16.msra.mxu0 %v4297_v46  ;;  %3303 = vmatmul.mubr.bf16.vlgmr.msra.gmra.mrb[24].mxu1 %v3474_v50  ;;  %v2813_v63 = vadd.f32 %v4624_v53, %v2772_v54  ;;  %v163_v53 = vmul.u32 2654435769, %v116_v3  ;;  %v4316_v50 = vld [vmem:[#allocation6 + $0x7b0] sm:$0xff]  }
 0x126   :  { %4043 = vmatprep.subr.bf16.mxu0 %v4299_v49  ;;  %3353 = vmatpush1.bf16.msra.mxu1 %v4298_v55  ;;  %v4656_v0 = vadd.f32 %v3776_v47, %v2775_v60  ;;  %v388_v55 = vmul.u32 3266489909, %v324_v40  ;;  %v293_v60 = vmul.u32 2246822507, %v261_v42 }
 0x127   :  { %3354 = vmatprep.subr.bf16.mxu1 %v4402_v37  ;;  %v3443_v13 = vshrl.u32 %v163_v53, 16 }
 0x128   :  { %vm452_vm6 = vcmp.ge.s32.totalorder %v388_v55, 0  ;;  %v325_v3 = vxor.u32 %v293_v60, %v4486_v52  ;;  %v357_v6 = vxor.u32 %v293_v60, %v4490_v4 }
 0x129   :  { %4044 = vmatpush3.bf16.msra.mxu0 %v4300_v56  ;;  %v259_v16 = vxor.u32 %v3443_v13, %v163_v53  ;;  %v420_v56 = vmul.u32 3266489909, %v356_v41 }
 0x12a   :  { %4045 = vmatprep.subr.bf16.mxu0 %v4302_v58  ;;  %3355 = vmatpush1.bf16.msra.mxu1 %v4301_v57  ;;  %v389_v9 = vmul.u32 3266489909, %v325_v3  ;;  %v421_v13 = vmul.u32 3266489909, %v357_v6 }
 0x12b   :  { %3356 = vmatprep.subr.bf16.mxu1 %v4402_v37  ;;  %v291_v2 = vmul.u32 2246822507, %v259_v16  ;;  %vm484_vm7 = vcmp.ge.s32.totalorder %v420_v56, 0 }
 0x12c   :  { %vm453_vm10 = vcmp.ge.s32.totalorder %v389_v9, 0  ;;  %vm485_vm12 = vcmp.ge.s32.totalorder %v421_v13, 0 }
 0x12d   :  { %4046 = vmatpush3.bf16.msra.mxu0 %v4303_v61  ;;  %v323_v33 = vxor.u32 %v291_v2, %v4486_v52  ;;  %v355_v34 = vxor.u32 %v291_v2, %v4490_v4  ;;  %v294_v61 = vmul.u32 2246822507, %v262_v48 }
 0x12e   :  { %4047 = vmatprep.subr.bf16.mxu0 %v4305_v62  ;;  %3357 = vmatpush1.bf16.msra.mxu1 %v4304_v1  ;;  %v4318_v62 = vld [vmem:[#allocation6 + $0x738] sm:$0xff]  }
 0x12f   :  { %3358 = vmatprep.subr.bf16.mxu1 %v4402_v37  ;;  %v387_v46 = vmul.u32 3266489909, %v323_v33  ;;  %v419_v47 = vmul.u32 3266489909, %v355_v34 }
 0x131   :  { %4048 = vmatpush3.bf16.msra.mxu0 %v4306_v5  ;;  %vm4673_vm4 = vcmp.ge.s32.totalorder %v387_v46, 0  ;;  %vm4677_vm5 = vcmp.ge.s32.totalorder %v419_v47, 0  ;;  %v326_v5 = vxor.u32 %v294_v61, %v4486_v52  ;;  %v63_v52 = vld [vmem:[#allocation3 + $0x78] sm:$0xff] }
 0x132   :  { %4049 = vmatprep.subr.bf16.mxu0 %v4308_v45  ;;  %3359 = vmatpush1.bf16.msra.mxu1 %v4307_v7  ;;  %vm501_vm8 = vmpackc.low %vm452_vm6, %vm4673_vm4  ;;  %v358_v45 = vxor.u32 %v294_v61, %v4490_v4  ;;  %v4319_v7 = vld [vmem:[#allocation6 + $0x7b8] sm:$0xff]   ;;  %v4320_v4 = vld [vmem:[#allocation6 + $0x7c0] sm:$0xff]  }
 0x133   :  { %3360 = vmatprep.subr.bf16.mxu1 %v4402_v37  ;;  %vm517_vm9 = vmpackc.low %vm484_vm7, %vm4677_vm5  ;;  %v390_v10 = vmul.u32 3266489909, %v326_v5 }
 0x135   :  { %4050 = vmatpush3.bf16.msra.mxu0 %v4309_v8  ;;  %v533_v8 = vsel %vm501_vm8, %v62_v51, 0  ;;  %vm454_vm11 = vcmp.ge.s32.totalorder %v390_v10, 0 }
 0x136   :  { %4051 = vmatprep.subr.bf16.mxu0 %v4311_v12  ;;  %3361 = vmatpush1.bf16.msra.mxu1 %v4310_v14  ;;  %v422_v14 = vmul.u32 3266489909, %v358_v45  ;;  %vm502_vm14 = vmpackc.low %vm454_vm11, %vm453_vm10 }
 0x137   :  { %3362 = vmatprep.subr.bf16.mxu1 %v4402_v37  ;;  %v534_v16 = vsel %vm502_vm14, %v63_v52, 0 }
 0x138   :  { %vm486_vm13 = vcmp.ge.s32.totalorder %v422_v14, 0 }
 0x139   :  { %4052 = vmatpush3.bf16.msra.mxu0 %v4312_v18  ;;  %vm518_vm15 = vmpackc.low %vm486_vm13, %vm485_vm12 }
 0x13a   :  { %4053 = vmatprep.subr.bf16.mxu0 %v4314_v19  ;;  %3363 = vmatpush1.bf16.msra.mxu1 %v4313_v26  ;;  %v4321_v19 = vld [vmem:[#allocation6 + $0x7c8] sm:$0xff]  }
 0x13b   :  { %3364 = vmatprep.subr.bf16.mxu1 %v4402_v37 }
 0x13d   :  { %4054 = vmatpush3.bf16.msra.mxu0 %v4315_v39 }
 0x13e   :  { %v3793_v17 = vpop.f32.mrb[4].mxu0  ;;  %4055 = vmatprep.subr.bf16.mxu0 %v4317_v44  ;;  %3365 = vmatpush1.bf16.msra.mxu1 %v4316_v50 }
 0x13f   :  { %v3815_v22 = vpop.f32.mrb[4].mxu1  ;;  %v3794_v24 = vpop.f32.mrb[5].mxu0  ;;  %3366 = vmatprep.subr.bf16.mxu1 %v4402_v37 }
 0x140   :  { %v3816_v25 = vpop.f32.mrb[5].mxu1  ;;  %v3795_v29 = vadd.f32 %v3794_v24, %v3793_v17  ;;  %v3796_v31 = vpop.f32.mrb[6].mxu0  ;;  %v550_v17 = vsel %vm518_vm15, %v79_v15, 0 }
 0x141   :  { %v3817_v30 = vadd.f32 %v3816_v25, %v3815_v22  ;;  %v3818_v32 = vpop.f32.mrb[6].mxu1  ;;  %v3797_v36 = vpop.f32.mrb[7].mxu0  ;;  %4056 = vmatpush3.bf16.msra.mxu0 %v4318_v62  ;;  %v3479_v18 = vcombine.high %v534_v16, %v550_v17  ;;  %v3478_v22 = vcombine.low %v534_v16, %v550_v17 }
 0x142   :  { %v3819_v38 = vpop.f32.mrb[7].mxu1  ;;  %v2854_v43 = vadd.f32 %v3795_v29, %v2813_v63  ;;  %v3798_v49 = vadd.f32 %v3797_v36, %v3796_v31  ;;  %v78_v63 = vld [vmem:[#allocation3 + $0xf0] sm:$0xff]  ;;  %3367 = vmatpush1.bf16.msra.mxu1 %v4319_v7 }
 0x143   :  { %v3820_v58 = vadd.f32 %v3819_v38, %v3818_v32  ;;  %3368 = vmatprep.subr.bf16.mxu1 %v4402_v37  ;;  %3732 = vmatprep.mubr.msk.bf16.mxu1 %vm2733_vm0, %v3479_v18 }
 0x144   :  { %v4670_v57 = vadd.f32 %v3817_v30, %v2854_v43  ;;  %v2857_v1 = vadd.f32 %v3798_v49, %v4656_v0  ;;  %v549_v0 = vsel %vm517_vm9, %v78_v63, 0 }
 0x145   :  { %v3476_v11 = vcombine.low %v533_v8, %v549_v0  ;;  %v3477_v12 = vcombine.high %v533_v8, %v549_v0 }
 0x146   :  { %v2898_v53 = vadd.f32 %v3820_v58, %v2857_v1  ;;  %3369 = vmatpush1.bf16.msra.mxu1 %v4320_v4 }
 0x147   :  { %3343 = vmatprep.mubr.bf16.mxu0 %v3477_v12  ;;  %3370 = vmatprep.subr.bf16.mxu1 %v4402_v37 }
 0x148   :  { %3344 = vmatmul.mubr.bf16.vlgmr.msra.gmra.mrb[28].mxu0 %v3476_v11 }
 0x14a   :  { %3371 = vmatpush1.bf16.msra.mxu1 %v4321_v19 }
 0x14b   :  { %3372 = vmatprep.subr.bf16.mxu1 %v4402_v37 }
 0x14e   :  { %3373 = vmatpush1.bf16.msra.mxu1 %v4322_v20 }
 0x14f   :  { %3374 = vmatprep.subr.bf16.mxu1 %v4402_v37 }
 0x152   :  { %3375 = vmatpush1.bf16.msra.mxu1 %v4323_v21 }
 0x155   :  { %3385 = vmatmul.mubr.bf16.vlgmr.msra.gmra.mrb[28].mxu1 %v3478_v22 }
 0x15e   :  { %v3837_v2 = vpop.f32.mrb[8].mxu0 }
 0x15f   :  { %v3838_v23 = vpop.f32.mrb[9].mxu0  ;;  %v3859_v24 = vpop.f32.mrb[8].mxu1 }
 0x160   :  { %v3839_v25 = vadd.f32 %v3838_v23, %v3837_v2  ;;  %v3840_v26 = vpop.f32.mrb[10].mxu0  ;;  %v3860_v27 = vpop.f32.mrb[9].mxu1 }
 0x161   :  { %v3841_v28 = vpop.f32.mrb[11].mxu0  ;;  %v3861_v30 = vadd.f32 %v3860_v27, %v3859_v24  ;;  %v3862_v31 = vpop.f32.mrb[10].mxu1 }
 0x162   :  { %v2936_v29 = vadd.f32 %v3839_v25, %v4670_v57  ;;  %v3842_v32 = vadd.f32 %v3841_v28, %v3840_v26  ;;  %v3863_v33 = vpop.f32.mrb[11].mxu1 }
 0x163   :  { %v3864_v36 = vadd.f32 %v3863_v33, %v3862_v31 }
 0x164   :  { %v2977_v34 = vadd.f32 %v3861_v30, %v2936_v29  ;;  %v2939_v35 = vadd.f32 %v3842_v32, %v2898_v53 }
 0x166   :  { %v2980_v37 = vadd.f32 %v3864_v36, %v2939_v35 }
 0x17e   :  { %v3881_v38 = vpop.f32.mrb[12].mxu0 }
 0x17f   :  { %v3882_v39 = vpop.f32.mrb[13].mxu0  ;;  %v3903_v40 = vpop.f32.mrb[12].mxu1 }
 0x180   :  { %v3883_v41 = vadd.f32 %v3882_v39, %v3881_v38  ;;  %v3884_v42 = vpop.f32.mrb[14].mxu0  ;;  %v3904_v43 = vpop.f32.mrb[13].mxu1 }
 0x181   :  { %v3885_v44 = vpop.f32.mrb[15].mxu0  ;;  %v3905_v47 = vadd.f32 %v3904_v43, %v3903_v40  ;;  %v3906_v48 = vpop.f32.mrb[14].mxu1 }
 0x182   :  { %v3018_v46 = vadd.f32 %v3883_v41, %v2977_v34  ;;  %v3886_v49 = vadd.f32 %v3885_v44, %v3884_v42  ;;  %v3907_v50 = vpop.f32.mrb[15].mxu1 }
 0x183   :  { %v3908_v56 = vadd.f32 %v3907_v50, %v3906_v48 }
 0x184   :  { %v3059_v51 = vadd.f32 %v3905_v47, %v3018_v46  ;;  %v3021_v55 = vadd.f32 %v3886_v49, %v2980_v37 }
 0x186   :  { %v3062_v57 = vadd.f32 %v3908_v56, %v3021_v55 }
 0x19e   :  { %v3925_v58 = vpop.f32.mrb[16].mxu0 }
 0x19f   :  { %v3926_v59 = vpop.f32.mrb[17].mxu0  ;;  %v3947_v54 = vpop.f32.mrb[16].mxu1 }
 0x1a0   :  { %v3927_v60 = vadd.f32 %v3926_v59, %v3925_v58  ;;  %v3928_v61 = vpop.f32.mrb[18].mxu0  ;;  %v3948_v62 = vpop.f32.mrb[17].mxu1 }
 0x1a1   :  { %v3929_v63 = vpop.f32.mrb[19].mxu0  ;;  %v3949_v3 = vadd.f32 %v3948_v62, %v3947_v54  ;;  %v3950_v5 = vpop.f32.mrb[18].mxu1 }
 0x1a2   :  { %v3100_v1 = vadd.f32 %v3927_v60, %v3059_v51  ;;  %v3930_v6 = vadd.f32 %v3929_v63, %v3928_v61  ;;  %v3951_v45 = vpop.f32.mrb[19].mxu1 }
 0x1a3   :  { %v3952_v53 = vadd.f32 %v3951_v45, %v3950_v5 }
 0x1a4   :  { %v3141_v7 = vadd.f32 %v3949_v3, %v3100_v1  ;;  %v3103_v8 = vadd.f32 %v3930_v6, %v3062_v57 }
 0x1a6   :  { %v3144_v0 = vadd.f32 %v3952_v53, %v3103_v8 }
 0x1be   :  { %v3969_v9 = vpop.f32.mrb[20].mxu0 }
 0x1bf   :  { %v3970_v10 = vpop.f32.mrb[21].mxu0  ;;  %v3991_v11 = vpop.f32.mrb[20].mxu1 }
 0x1c0   :  { %v3971_v12 = vadd.f32 %v3970_v10, %v3969_v9  ;;  %v3972_v52 = vpop.f32.mrb[22].mxu0  ;;  %v3992_v13 = vpop.f32.mrb[21].mxu1 }
 0x1c1   :  { %v3973_v14 = vpop.f32.mrb[23].mxu0  ;;  %v3993_v4 = vadd.f32 %v3992_v13, %v3991_v11  ;;  %v3994_v16 = vpop.f32.mrb[22].mxu1 }
 0x1c2   :  { %v3182_v15 = vadd.f32 %v3971_v12, %v3141_v7  ;;  %v3974_v17 = vadd.f32 %v3973_v14, %v3972_v52  ;;  %v3995_v18 = vpop.f32.mrb[23].mxu1 }
 0x1c3   :  { %v3996_v21 = vadd.f32 %v3995_v18, %v3994_v16 }
 0x1c4   :  { %v3223_v19 = vadd.f32 %v3993_v4, %v3182_v15  ;;  %v3185_v20 = vadd.f32 %v3974_v17, %v3144_v0 }
 0x1c6   :  { %v3226_v22 = vadd.f32 %v3996_v21, %v3185_v20 }
 0x1f7   :  { %v4013_v2 = vpop.f32.mrb[24].mxu0 }
 0x1f8   :  { %v4014_v23 = vpop.f32.mrb[25].mxu0  ;;  %v4035_v24 = vpop.f32.mrb[24].mxu1 }
 0x1f9   :  { %v4015_v25 = vadd.f32 %v4014_v23, %v4013_v2  ;;  %v4016_v26 = vpop.f32.mrb[26].mxu0  ;;  %v4036_v27 = vpop.f32.mrb[25].mxu1 }
 0x1fa   :  { %v4017_v28 = vpop.f32.mrb[27].mxu0  ;;  %v4037_v30 = vadd.f32 %v4036_v27, %v4035_v24  ;;  %v4038_v31 = vpop.f32.mrb[26].mxu1 }
 0x1fb   :  { %v3264_v29 = vadd.f32 %v4015_v25, %v3223_v19  ;;  %v4018_v32 = vadd.f32 %v4017_v28, %v4016_v26  ;;  %v4039_v33 = vpop.f32.mrb[27].mxu1 }
 0x1fc   :  { %v4040_v36 = vadd.f32 %v4039_v33, %v4038_v31 }
 0x1fd   :  { %v3305_v34 = vadd.f32 %v4037_v30, %v3264_v29  ;;  %v3267_v35 = vadd.f32 %v4018_v32, %v3226_v22 }
 0x1ff   :  { %v3308_v37 = vadd.f32 %v4040_v36, %v3267_v35 }
 0x21b   :  { %v4057_v38 = vpop.f32.mrb[28].mxu0 }
 0x21c   :  { %v4058_v39 = vpop.f32.mrb[29].mxu0 }
 0x21d   :  { %v4059_v40 = vadd.f32 %v4058_v39, %v4057_v38  ;;  %v4060_v41 = vpop.f32.mrb[30].mxu0 }
 0x21e   :  { %v4061_v42 = vpop.f32.mrb[31].mxu0 }
 0x21f   :  { %v4062_v43 = vadd.f32 %v4061_v42, %v4060_v41  ;;  %v3346_v44 = vadd.f32 %v4059_v40, %v3305_v34 }
 0x221   :  { %v3349_v46 = vadd.f32 %v4062_v43, %v3308_v37 }
 0x228   :  { %v3386_v47 = vpop.f32.mrb[28].mxu1 }
 0x229   :  { %v3387_v48 = vadd.f32 %v3386_v47, %v3346_v44  ;;  %v3388_v49 = vpop.f32.mrb[29].mxu1 }
 0x22a   :  { %v3389_v50 = vpop.f32.mrb[30].mxu1 }
 0x22b   :  { %3393 = vst [vmem:[#allocation8] sm:$0xff] %v3387_v48  ;;  %v3390_v51 = vadd.f32 %v3389_v50, %v3349_v46  ;;  %v3391_v55 = vpop.f32.mrb[31].mxu1 }
 0x22d   :  { %3394 = vst [vmem:[#allocation8 + $0x8] sm:$0xff] %v3390_v51 }
 0x22e   :  { %3399 = vsyncadd [#allocation5], 128  ;;  %s4403_s3 = smov [#allocation8]  }
 0x22f   :  { %s3400_s20 = sshll.u32 %s4403_s3, 4  ;;  %s3401_s20 = int_to_ptr.vmem [resolvable:$true] %s3400_s20 }
 0x230   :  { %s4368_s21 = scalar_lea.vmem %s3401_s20, 128  ;;  %s4372_s22 = scalar_lea.vmem %s3401_s20, 256 }
 0x231   :  { %p4369_p2 = scmp.ne.s32.totalorder %s3401_s20, %s4368_s21  ;;  %p4373_p3 = scmp.lt.s32.totalorder %s3401_s20, %s3401_s20 }
 0x232   :  { %p4374_p4 = scmp.lt.s32.totalorder %s4372_s22, %s4368_s21 }
 0x234   :  { %p4375_p5 = por %p4374_p4, %p4373_p3 }
 0x236   :  { %p4376_p6 = pnand %p4375_p5, %p4369_p2 }
 0x238   :  { %4379 = shalt.err (!%p4376_p6)
}
 0x239   :  { %s4380_s25 = scalar_lea.hbm %s4714_s4, 128 }
 0x23a   :  { %p4381_p7 = scmp.ne.s32.totalorder %s4714_s4, %s4380_s25  ;;  %p4384_p8 = scmp.lt.u32.totalorder %s4380_s25, %s4714_s4 }
 0x23c   :  { %p4386_p9 = pnand %p4384_p8, %p4381_p7 }
 0x23e   :  { %4389 = shalt.err (!%p4386_p9)
}
 0x23f   :  { %s4404_s5 = smov 8  }
 0x240   :  { %3406 = dma.vmem_to_hbm [thread:$0]  %s3401_s20, 128, %s4714_s4, [#allocation5], %s4398_s27, %s4398_s27, %s4404_s5  }
 0x241   :  { %4394 = dma.done.wait [#allocation5], 256  }
 0x242   :  { %4395 = vsyncadd [#allocation5], 4294967040 }
 0x243   :  { %3410 = vsyncpa [#allocation4], 1 }
 0x244   :  { %3411 = vsyncpa [#allocation7], 1 }
 0x245   :  { %3412 = vsyncpa [#allocation5], 1 }

</bundles_post_ra>
